<compile_context>
chip_gen: v6e
topology: v6e:2x2x1
jax: 0.10.0
libtpu: 0.0.40
codegen_flags: <defaults>
</compile_context>

<pallas_src>
import math

import jax
import jax.numpy as jnp
from jax.experimental import pallas as pl
from jax.experimental.pallas import tpu as pltpu


# ----------------------------------------------------------------------------
# Kernel 1: one LAGCN1 branch-pair per grid step (pair 0 = SGCN1+CGCN on adj,
#           pair 1 = CGCN+SGCN2 on nsadj).
# ----------------------------------------------------------------------------
def _make_pair_kernel(n_mid, w_branch, nhid):
    two_w = 2 * w_branch

    def kernel(xcat_ref, adj_ref, w0_ref, ss0_ref, linn_ref, *rest):
        if n_mid:
            wm_ref, ssm_ref, wf_ref, bf_ref, out_ref = rest
        else:
            wf_ref, bf_ref, out_ref = rest

        xcat = xcat_ref[...]                   # [N, C*F] bf16
        adj = adj_ref[0]                       # [N, N]   bf16

        # ---- layer 0: one wide matmul per pair (block-packed weights) -------
        sup0 = jnp.dot(xcat, w0_ref[0], preferred_element_type=jnp.float32)
        agg = jnp.dot(adj, sup0.astype(jnp.bfloat16),
                      preferred_element_type=jnp.float32)          # [N, 2w] f32
        ss0 = ss0_ref[0]                                           # [2, 2w] f32
        h = jnp.maximum(agg * ss0[0:1, :] + ss0[1:2, :], 0.0)      # bias folded
        inp = h
        x = h

        linn = linn_ref[0]                                         # [5, 2w] f32
        col = jax.lax.broadcasted_iota(jnp.int32, (1, two_w), 1)
        mask_a = (col < w_branch).astype(jnp.float32)              # [1, 2w]
        mask_b = 1.0 - mask_a

        alpha_wide = None

        # ---- middle layers ---------------------------------------------------
        if n_mid:
            wm_all = wm_ref[0]                 # [n_mid, 2w, 2w] bf16
            ssm_all = ssm_ref[0]               # [n_mid, 2, 2w]  f32
            for j in range(n_mid):
                # linn gate score per branch: VPU multiply + lane reduction
                # (zero-padded weight rows, no per-branch slicing, no 1-wide MXU pass)
                sA = (jnp.sum(inp * linn[0:1, :] + x * linn[1:2, :],
                              axis=-1, keepdims=True) + linn[4:5, 0:1])
                sB = (jnp.sum(inp * linn[2:3, :] + x * linn[3:4, :],
                              axis=-1, keepdims=True) + linn[4:5, 1:2])
                aA = 1.0 / (1.0 + jnp.exp(-sA))
                aB = 1.0 / (1.0 + jnp.exp(-sB))
                alpha_wide = aA * mask_a + aB * mask_b             # [N, 2w]
                xg = alpha_wide * x + (1.0 - alpha_wide) * inp
                sup = jnp.dot(xg.astype(jnp.bfloat16), wm_all[j],
                              preferred_element_type=jnp.float32)
                agg = jnp.dot(adj, sup.astype(jnp.bfloat16),
                              preferred_element_type=jnp.float32)
                x = jnp.maximum(agg * ssm_all[j, 0:1, :] + ssm_all[j, 1:2, :], 0.0)

        # ---- final layer: gate reuses the LAST middle-layer alpha (PyTorch) --
        if alpha_wide is not None:
            xg = alpha_wide * x + (1.0 - alpha_wide) * inp
        else:
            xg = x  # TODO(synk): num_layers == 2 leaves alpha undefined in PyTorch
        sup = jnp.dot(xg.astype(jnp.bfloat16), wf_ref[0],
                      preferred_element_type=jnp.float32)          # [N, 2*nhid]
        z = (jnp.dot(adj, sup.astype(jnp.bfloat16),
                     preferred_element_type=jnp.float32) + bf_ref[0])

        # ---- per-branch log-softmax via masked reductions (no lane slicing) --
        colz = jax.lax.broadcasted_iota(jnp.int32, (1, 2 * nhid), 1)
        mA = (colz < nhid).astype(jnp.float32)
        mB = 1.0 - mA
        neg = jnp.float32(-1e30)
        zmaxA = jnp.max(jnp.where(colz < nhid, z, neg), axis=-1, keepdims=True)
        zmaxB = jnp.max(jnp.where(colz < nhid, neg, z), axis=-1, keepdims=True)
        zmax = zmaxA * mA + zmaxB * mB
        e = jnp.exp(z - zmax)
        seA = jnp.sum(e * mA, axis=-1, keepdims=True)
        seB = jnp.sum(e * mB, axis=-1, keepdims=True)
        lse = jnp.log(seA) * mA + jnp.log(seB) * mB
        out_ref[0] = z - zmax - lse

    return kernel


# ----------------------------------------------------------------------------
# Kernel 2: attention over the 3 views + MLP head, one lane-dense output slab.
# ----------------------------------------------------------------------------
def _make_head_kernel(nhid, nclass, slab_w):
    def kernel(pair_ref, w1_ref, b1_ref, w2_ref, mlpw_ref, mlpb_ref, out_ref):
        p0 = pair_ref[0]                       # [N, 2*nhid] f32 : [emb1 | com1]
        p1 = pair_ref[1]                       # [N, 2*nhid] f32 : [com2 | emb2]
        emb1 = p0[:, :nhid]
        com1 = p0[:, nhid:]
        com2 = p1[:, :nhid]
        emb2 = p1[:, nhid:]
        xcom = (com1 + com2) * 0.5

        w1 = w1_ref[...]                       # [nhid, Hatt] bf16 (shared, hot)
        b1 = b1_ref[...]                       # [1, Hatt]    f32
        w2 = w2_ref[...]                       # [1, Hatt]    f32

        def view_score(v):
            h = jnp.tanh(jnp.dot(v.astype(jnp.bfloat16), w1,
                                 preferred_element_type=jnp.float32) + b1)
            # output-width-1 projection as VPU multiply + lane reduction
            return jnp.sum(h * w2, axis=-1, keepdims=True)

        s1 = view_score(emb1)
        s2 = view_score(emb2)
        s3 = view_score(xcom)
        m = jnp.maximum(jnp.maximum(s1, s2), s3)
        e1 = jnp.exp(s1 - m)
        e2 = jnp.exp(s2 - m)
        e3 = jnp.exp(s3 - m)
        inv = 1.0 / (e1 + e2 + e3)
        a1 = e1 * inv
        a2 = e2 * inv
        a3 = e3 * inv
        emb = a1 * emb1 + a2 * emb2 + a3 * xcom

        logits = (jnp.dot(emb.astype(jnp.bfloat16), mlpw_ref[...],
                          preferred_element_type=jnp.float32) + mlpb_ref[...])
        lmax = jnp.max(logits, axis=-1, keepdims=True)
        lz = logits - lmax
        output = lz - jnp.log(jnp.sum(jnp.exp(lz), axis=-1, keepdims=True))

        parts = [output, a1, a2, a3, emb]
        pad_w = slab_w - (nclass + 3 + nhid)
        if pad_w:
            parts.append(jnp.zeros((emb.shape[0], pad_w), jnp.float32))
        out_ref[...] = jnp.concatenate(parts, axis=-1)   # one lane-dense store

    return kernel


# ----------------------------------------------------------------------------
# Host-side parameter packing (per pair of LAGCN1 branches sharing an adj)
# ----------------------------------------------------------------------------
def _layer0_fold(p, concat):
    sc = jnp.concatenate([p["bns_initial"][i]["scale"] for i in range(concat)], -1)[0]
    b = jnp.concatenate([p["convs_initial"][i]["b"] for i in range(concat)], -1)[0]
    sh = jnp.concatenate([p["bns_initial"][i]["shift"] for i in range(concat)], -1)[0]
    return sc, b * sc + sh     # relu((y+b)*sc+sh) == relu(y*sc + (b*sc+sh))


def _pack_pair(pA, pB, concat, nfeat, nhid):
    w = concat * nhid
    W2 = 2 * w
    n_mid = len(pA["convs"]) - 1

    # layer 0: X_cat @ W0 == [x0@W0A | x1@W1A | x0@W0B | x1@W1B]
    W0 = jnp.zeros((concat * nfeat, W2), jnp.float32)
    for i in range(concat):
        W0 = W0.at[i * nfeat:(i + 1) * nfeat,
                   i * nhid:(i + 1) * nhid].set(pA["convs_initial"][i]["W"])
        W0 = W0.at[i * nfeat:(i + 1) * nfeat,
                   w + i * nhid:w + (i + 1) * nhid].set(pB["convs_initial"][i]["W"])
    scA, shA = _layer0_fold(pA, concat)
    scB, shB = _layer0_fold(pB, concat)
    ss0 = jnp.stack([jnp.concatenate([scA, scB]),
                     jnp.concatenate([shA, shB])], axis=0)          # [2, W2]

    # linn gate weights, zero-padded to pair width; biases stashed in row 4
    z = jnp.zeros((w,), jnp.float32)
    lwA = pA["linn"]["W"][:, 0]
    lwB = pB["linn"]["W"][:, 0]
    brow = jnp.zeros((W2,), jnp.float32)
    brow = brow.at[0].set(pA["linn"]["b"][0, 0]).at[1].set(pB["linn"]["b"][0, 0])
    linn = jnp.stack([jnp.concatenate([lwA[:w], z]),
                      jnp.concatenate([lwA[w:], z]),
                      jnp.concatenate([z, lwB[:w]]),
                      jnp.concatenate([z, lwB[w:]]),
                      brow], axis=0)                                # [5, W2]

    out = {"W0": W0, "ss0": ss0, "linn": linn}

    if n_mid:
        wms, ssms = [], []
        for j in range(n_mid):
            blk = jnp.zeros((W2, W2), jnp.float32)
            blk = blk.at[:w, :w].set(pA["convs"][j]["W"])
            blk = blk.at[w:, w:].set(pB["convs"][j]["W"])
            wms.append(blk)
            scAj = pA["bns"][j]["scale"][0]
            shAj = (pA["convs"][j]["b"] * pA["bns"][j]["scale"] + pA["bns"][j]["shift"])[0]
            scBj = pB["bns"][j]["scale"][0]
            shBj = (pB["convs"][j]["b"] * pB["bns"][j]["scale"] + pB["bns"][j]["shift"])[0]
            ssms.append(jnp.stack([jnp.concatenate([scAj, scBj]),
                                   jnp.concatenate([shAj, shBj])], axis=0))
        out["Wm"] = jnp.stack(wms, axis=0)                          # [n_mid, W2, W2]
        out["ssm"] = jnp.stack(ssms, axis=0)                        # [n_mid, 2, W2]

    Wf = jnp.zeros((W2, 2 * nhid), jnp.float32)
    Wf = Wf.at[:w, :nhid].set(pA["convs"][-1]["W"])
    Wf = Wf.at[w:, nhid:].set(pB["convs"][-1]["W"])
    out["Wf"] = Wf
    out["bf"] = jnp.concatenate([pA["convs"][-1]["b"], pB["convs"][-1]["b"]], -1)
    return out


def _vmem_limit(arrays, out_shapes):
    foot = 0
    for a in arrays:
        foot += math.prod(a.shape) * jnp.dtype(a.dtype).itemsize
    for s in out_shapes:
        foot += math.prod(s.shape) * jnp.dtype(s.dtype).itemsize
    try:
        cap = int(getattr(pltpu.get_tpu_info(), "vmem_capacity_bytes", 128 << 20))
    except Exception:
        cap = 64 << 20           # conservative: v7x physical VMEM per TensorCore
    want = 4 * foot + (8 << 20)  # double-buffered operands + intermediates + headroom
    return int(max(32 << 20, min(want, (cap * 3) // 4)))


# ----------------------------------------------------------------------------
# Forward wrapper
# ----------------------------------------------------------------------------
def sfgcn_forward(params, x_list, adj, nsadj):
    N = adj.shape[0]
    concat = len(x_list)
    nfeat = x_list[0].shape[1]
    nhid = params["mlp"]["W"].shape[0]
    nclass = params["mlp"]["W"].shape[1]
    w = concat * nhid
    W2 = 2 * w
    CF = concat * nfeat
    n_mid = len(params["SGCN1"]["convs"]) - 1

    # ---- host-side packing (pair 0: SGCN1+CGCN on adj, pair 1: CGCN+SGCN2 on nsadj)
    pair0 = _pack_pair(params["SGCN1"], params["CGCN"], concat, nfeat, nhid)
    pair1 = _pack_pair(params["CGCN"], params["SGCN2"], concat, nfeat, nhid)

    def stk(key, dtype):
        return jnp.stack([pair0[key], pair1[key]], axis=0).astype(dtype)

    xcat = jnp.concatenate(list(x_list), axis=-1).astype(jnp.bfloat16)   # [N, C*F]
    adj_stk = jnp.stack([adj, nsadj], axis=0).astype(jnp.bfloat16)       # [2, N, N]
    w0 = stk("W0", jnp.bfloat16)
    ss0 = stk("ss0", jnp.float32)
    linn = stk("linn", jnp.float32)
    wf = stk("Wf", jnp.bfloat16)
    bf = stk("bf", jnp.float32)

    args = [xcat, adj_stk, w0, ss0, linn]
    in_specs = [
        pl.BlockSpec((N, CF), lambda i: (0, 0)),
        pl.BlockSpec((1, N, N), lambda i: (i, 0, 0)),
        pl.BlockSpec((1, CF, W2), lambda i: (i, 0, 0)),
        pl.BlockSpec((1, 2, W2), lambda i: (i, 0, 0)),
        pl.BlockSpec((1, 5, W2), lambda i: (i, 0, 0)),
    ]
    if n_mid:
        wm = stk("Wm", jnp.bfloat16)
        ssm = stk("ssm", jnp.float32)
        args += [wm, ssm]
        in_specs += [
            pl.BlockSpec((1, n_mid, W2, W2), lambda i: (i, 0, 0, 0)),
            pl.BlockSpec((1, n_mid, 2, W2), lambda i: (i, 0, 0, 0)),
        ]
    args += [wf, bf]
    in_specs += [
        pl.BlockSpec((1, W2, 2 * nhid), lambda i: (i, 0, 0)),
        pl.BlockSpec((1, 1, 2 * nhid), lambda i: (i, 0, 0)),
    ]

    pair_out_shape = jax.ShapeDtypeStruct((2, N, 2 * nhid), jnp.float32)
    pair_out = pl.pallas_call(
        _make_pair_kernel(n_mid, w, nhid),
        out_shape=pair_out_shape,
        grid=(2,),
        in_specs=in_specs,
        out_specs=pl.BlockSpec((1, N, 2 * nhid), lambda i: (i, 0, 0)),
        compiler_params=pltpu.CompilerParams(
            dimension_semantics=("parallel",),   # one pair per TensorCore on v7x
            vmem_limit_bytes=_vmem_limit(args, [pair_out_shape])),
    )(*args)

    # ---- attention + MLP head (tiny follow-up kernel, lane-dense output slab)
    att_hidden = params["att_l1"]["W"].shape[1]
    att_w1 = params["att_l1"]["W"].astype(jnp.bfloat16)
    att_b1 = params["att_l1"]["b"].astype(jnp.float32)
    att_w2 = params["att_l2"]["W"].T.astype(jnp.float32)     # [1, att_hidden]
    mlp_w = params["mlp"]["W"].astype(jnp.bfloat16)
    mlp_b = params["mlp"]["b"].astype(jnp.float32)

    slab_w = ((nclass + 3 + nhid + 127) // 128) * 128
    head_args = [pair_out, att_w1, att_b1, att_w2, mlp_w, mlp_b]
    slab_shape = jax.ShapeDtypeStruct((N, slab_w), jnp.float32)
    vmem_spec = pl.BlockSpec(memory_space=pltpu.MemorySpace.VMEM)
    slab = pl.pallas_call(
        _make_head_kernel(nhid, nclass, slab_w),
        out_shape=slab_shape,
        in_specs=[vmem_spec] * len(head_args),
        out_specs=vmem_spec,
        compiler_params=pltpu.CompilerParams(
            vmem_limit_bytes=_vmem_limit(head_args, [slab_shape])),
    )(*head_args)

    # ---- host-side slicing of the lane-dense slab / pair outputs -------------
    output = slab[:, :nclass]
    att = slab[:, nclass:nclass + 3][:, :, None]
    emb = slab[:, nclass + 3:nclass + 3 + nhid]
    emb1 = pair_out[0, :, :nhid]
    com1 = pair_out[0, :, nhid:]
    com2 = pair_out[1, :, :nhid]
    emb2 = pair_out[1, :, nhid:]
    return output, att, emb1, com1, com2, emb2, emb


# ----------------------------------------------------------------------------
# Deterministic parameter initialization (shapes follow the PyTorch __init__)
# ----------------------------------------------------------------------------
def _init_gcn(key, fin, fout):
    k1, k2 = jax.random.split(key)
    stdv = 1.0 / (fout ** 0.5)
    return {
        "W": jax.random.uniform(k1, (fin, fout), jnp.float32, -stdv, stdv),
        "b": jax.random.uniform(k2, (1, fout), jnp.float32, -stdv, stdv),
    }


def _init_linear(key, fin, fout, bias=True):
    k1, k2 = jax.random.split(key)
    bound = 1.0 / (fin ** 0.5)
    p = {"W": jax.random.uniform(k1, (fin, fout), jnp.float32, -bound, bound)}
    if bias:
        p["b"] = jax.random.uniform(k2, (1, fout), jnp.float32, -bound, bound)
    return p


def _init_bn(key, f, eps=1e-5):
    # eval-mode BatchNorm1d folded with its running statistics
    k1, k2 = jax.random.split(key)
    gamma = 1.0 + 0.1 * jax.random.normal(k1, (1, f), jnp.float32)
    beta = 0.1 * jax.random.normal(k2, (1, f), jnp.float32)
    running_mean = jnp.zeros((1, f), jnp.float32)
    running_var = jnp.ones((1, f), jnp.float32)
    scale = gamma / jnp.sqrt(running_var + eps)
    shift = beta - running_mean * scale
    return {"scale": scale, "shift": shift}


def init_lagcn1(key, concat, nfeat, nhid, nclass, num_layers):
    keys = iter(jax.random.split(key, 4 * concat + 4 * num_layers + 8))
    p = {"convs_initial": [], "bns_initial": [], "convs": [], "bns": []}
    for _ in range(concat):
        p["convs_initial"].append(_init_gcn(next(keys), nfeat, nhid))
        p["bns_initial"].append(_init_bn(next(keys), nhid))
    p["linn"] = _init_linear(next(keys), 2 * concat * nhid, 1)
    for _ in range(num_layers - 2):
        p["convs"].append(_init_gcn(next(keys), concat * nhid, concat * nhid))
        p["bns"].append(_init_bn(next(keys), concat * nhid))
    p["convs"].append(_init_gcn(next(keys), concat * nhid, nhid))
    # linn2 / ml are declared in the PyTorch module but never used in forward().
    return p


def init_sfgcn(key, concat, nfeat, nhid, nclass, numlayers, att_hidden=16):
    k = jax.random.split(key, 8)
    return {
        "SGCN1": init_lagcn1(k[0], concat, nfeat, nhid, nclass, numlayers),
        "SGCN2": init_lagcn1(k[1], concat, nfeat, nhid, nclass, numlayers),
        "CGCN": init_lagcn1(k[2], concat, nfeat, nhid, nclass, numlayers),
        # self.a is declared but unused in forward().
        "att_l1": _init_linear(k[3], nhid, att_hidden),
        "att_l2": _init_linear(k[4], att_hidden, 1, bias=False),
        "mlp": _init_linear(k[5], nhid, nclass),
    }


# ----------------------------------------------------------------------------
if __name__ == "__main__":
    key = jax.random.PRNGKey(0)
    N, nfeat, nhid, nclass, concat, numlayers = 64, 32, 16, 8, 2, 3

    kp, kx, ka, kn = jax.random.split(key, 4)
    params = init_sfgcn(kp, concat, nfeat, nhid, nclass, numlayers)

    xs = jax.random.split(kx, concat)
    x_list = [jax.random.normal(xs[i], (N, nfeat), jnp.float32) for i in range(concat)]

    def make_adj(k):
        a = jax.random.uniform(k, (N, N), jnp.float32)
        a = (a > 0.8).astype(jnp.float32) + jnp.eye(N, dtype=jnp.float32)
        return a / jnp.sum(a, axis=1, keepdims=True)   # row-normalized

    adj = make_adj(ka)
    nsadj = make_adj(kn)

    outs = jax.block_until_ready(sfgcn_forward(params, x_list, adj, nsadj))
    output, att, emb1, com1, com2, emb2, emb = outs

    assert output.shape == (N, nclass)
    assert att.shape == (N, 3, 1)
    assert emb1.shape == (N, nhid) and emb2.shape == (N, nhid)
    assert com1.shape == (N, nhid) and com2.shape == (N, nhid)
    assert emb.shape == (N, nhid)
    assert bool(jnp.all(jnp.isfinite(output)))
    assert bool(jnp.all(jnp.isfinite(emb)))
    # attention weights must sum to 1 per node
    assert bool(jnp.all(jnp.abs(jnp.sum(att[:, :, 0], axis=1) - 1.0) < 1e-4))
    # per-branch log-softmax outputs must normalize to 1 in prob space
    assert bool(jnp.all(jnp.abs(jnp.sum(jnp.exp(output), axis=1) - 1.0) < 1e-3))
    assert bool(jnp.all(jnp.abs(jnp.sum(jnp.exp(emb1), axis=1) - 1.0) < 1e-3))
    print("KERNEL_OK")
</pallas_src>

<mosaic_0001>
module attributes {stable_mosaic.version = 11 : i64} {
  func.func @kernel(%arg0: i32, %arg1: memref<64x64xbf16, #tpu.memory_space<vmem>>, %arg2: memref<1x64x64xbf16, #tpu.memory_space<vmem>>, %arg3: memref<1x64x64xbf16, #tpu.memory_space<vmem>>, %arg4: memref<1x2x64xf32, #tpu.memory_space<vmem>>, %arg5: memref<1x5x64xf32, #tpu.memory_space<vmem>>, %arg6: memref<1x1x64x64xbf16, #tpu.memory_space<vmem>>, %arg7: memref<1x1x2x64xf32, #tpu.memory_space<vmem>>, %arg8: memref<1x64x32xbf16, #tpu.memory_space<vmem>>, %arg9: memref<1x1x32xf32, #tpu.memory_space<vmem>>, %arg10: memref<1x64x32xf32, #tpu.memory_space<vmem>>) attributes {dimension_semantics = [#tpu.dimension_semantics<parallel>], iteration_bounds = array<i64: 2>, scalar_prefetch = 0 : i64, scratch_operands = 0 : i64, tpu.core_type = #tpu.core_type<tc>, window_params = [{pipeline_mode = #tpu.pipeline_mode<synchronous>, transform_indices = @transform_0, window_bounds = array<i64: 64, 64>}, {transform_indices = @transform_1, window_bounds = array<i64: 1, 64, 64>}, {transform_indices = @transform_2, window_bounds = array<i64: 1, 64, 64>}, {transform_indices = @transform_3, window_bounds = array<i64: 1, 2, 64>}, {transform_indices = @transform_4, window_bounds = array<i64: 1, 5, 64>}, {transform_indices = @transform_5, window_bounds = array<i64: 1, 1, 64, 64>}, {transform_indices = @transform_6, window_bounds = array<i64: 1, 1, 2, 64>}, {transform_indices = @transform_7, window_bounds = array<i64: 1, 64, 32>}, {transform_indices = @transform_8, window_bounds = array<i64: 1, 1, 32>}, {transform_indices = @transform_9, window_bounds = array<i64: 1, 64, 32>}]} {
    %c0 = arith.constant 0 : index
    %c0_0 = arith.constant 0 : index
    %0 = vector.load %arg1[%c0, %c0_0] : memref<64x64xbf16, #tpu.memory_space<vmem>>, vector<64x64xbf16>
    %c0_1 = arith.constant 0 : index
    %c0_2 = arith.constant 0 : index
    %c0_3 = arith.constant 0 : index
    %1 = vector.load %arg2[%c0_1, %c0_2, %c0_3] : memref<1x64x64xbf16, #tpu.memory_space<vmem>>, vector<1x64x64xbf16>
    %2 = vector.shape_cast %1 : vector<1x64x64xbf16> to vector<64x64xbf16>
    %c0_4 = arith.constant 0 : index
    %c0_5 = arith.constant 0 : index
    %c0_6 = arith.constant 0 : index
    %3 = vector.load %arg3[%c0_4, %c0_5, %c0_6] : memref<1x64x64xbf16, #tpu.memory_space<vmem>>, vector<1x64x64xbf16>
    %4 = vector.shape_cast %3 : vector<1x64x64xbf16> to vector<64x64xbf16>
    %cst = arith.constant dense<0.000000e+00> : vector<64x64xf32>
    %5 = tpu.matmul %0, %4, %cst {dimension_numbers = #tpu.dot_dimension_numbers<[1], [0], [0], [1], [0, 0, 1, 1], [], []>} : vector<64x64xbf16>, vector<64x64xbf16>, vector<64x64xf32> -> vector<64x64xf32>
    %6 = arith.truncf %5 : vector<64x64xf32> to vector<64x64xbf16>
    %cst_7 = arith.constant dense<0.000000e+00> : vector<64x64xf32>
    %7 = tpu.matmul %2, %6, %cst_7 {dimension_numbers = #tpu.dot_dimension_numbers<[1], [0], [0], [1], [0, 0, 1, 1], [], []>} : vector<64x64xbf16>, vector<64x64xbf16>, vector<64x64xf32> -> vector<64x64xf32>
    %c0_8 = arith.constant 0 : index
    %c0_9 = arith.constant 0 : index
    %c0_10 = arith.constant 0 : index
    %8 = vector.load %arg4[%c0_8, %c0_9, %c0_10] : memref<1x2x64xf32, #tpu.memory_space<vmem>>, vector<1x2x64xf32>
    %9 = vector.shape_cast %8 : vector<1x2x64xf32> to vector<2x64xf32>
    %10 = vector.extract_strided_slice %9 {offsets = [0, 0], sizes = [1, 64], strides = [1, 1]} : vector<2x64xf32> to vector<1x64xf32>
    %11 = vector.broadcast %10 : vector<1x64xf32> to vector<64x64xf32>
    %12 = arith.mulf %7, %11 : vector<64x64xf32>
    %13 = vector.extract_strided_slice %9 {offsets = [1, 0], sizes = [1, 64], strides = [1, 1]} : vector<2x64xf32> to vector<1x64xf32>
    %14 = vector.broadcast %13 : vector<1x64xf32> to vector<64x64xf32>
    %15 = arith.addf %12, %14 : vector<64x64xf32>
    %cst_11 = arith.constant 0.000000e+00 : f32
    %16 = vector.broadcast %cst_11 : f32 to vector<64x64xf32>
    %17 = arith.maximumf %15, %16 : vector<64x64xf32>
    %c0_12 = arith.constant 0 : index
    %c0_13 = arith.constant 0 : index
    %c0_14 = arith.constant 0 : index
    %18 = vector.load %arg5[%c0_12, %c0_13, %c0_14] : memref<1x5x64xf32, #tpu.memory_space<vmem>>, vector<1x5x64xf32>
    %19 = vector.shape_cast %18 : vector<1x5x64xf32> to vector<5x64xf32>
    %20 = tpu.iota {dimensions = array<i32: 1>} : vector<1x64xi32>
    %c32_i32 = arith.constant 32 : i32
    %21 = vector.broadcast %c32_i32 : i32 to vector<1x64xi32>
    %22 = arith.cmpi slt, %20, %21 : vector<1x64xi32>
    %23 = arith.extui %22 : vector<1x64xi1> to vector<1x64xi32>
    %24 = arith.sitofp %23 : vector<1x64xi32> to vector<1x64xf32>
    %cst_15 = arith.constant 1.000000e+00 : f32
    %25 = vector.broadcast %cst_15 : f32 to vector<1x64xf32>
    %26 = arith.subf %25, %24 : vector<1x64xf32>
    %c0_16 = arith.constant 0 : index
    %c0_17 = arith.constant 0 : index
    %c0_18 = arith.constant 0 : index
    %c0_19 = arith.constant 0 : index
    %27 = vector.load %arg6[%c0_16, %c0_17, %c0_18, %c0_19] : memref<1x1x64x64xbf16, #tpu.memory_space<vmem>>, vector<1x1x64x64xbf16>
    %28 = vector.shape_cast %27 : vector<1x1x64x64xbf16> to vector<1x64x64xbf16>
    %c0_20 = arith.constant 0 : index
    %c0_21 = arith.constant 0 : index
    %c0_22 = arith.constant 0 : index
    %c0_23 = arith.constant 0 : index
    %29 = vector.load %arg7[%c0_20, %c0_21, %c0_22, %c0_23] : memref<1x1x2x64xf32, #tpu.memory_space<vmem>>, vector<1x1x2x64xf32>
    %30 = vector.shape_cast %29 : vector<1x1x2x64xf32> to vector<1x2x64xf32>
    %31 = vector.extract_strided_slice %19 {offsets = [0, 0], sizes = [1, 64], strides = [1, 1]} : vector<5x64xf32> to vector<1x64xf32>
    %32 = vector.broadcast %31 : vector<1x64xf32> to vector<64x64xf32>
    %33 = arith.mulf %17, %32 : vector<64x64xf32>
    %34 = vector.extract_strided_slice %19 {offsets = [1, 0], sizes = [1, 64], strides = [1, 1]} : vector<5x64xf32> to vector<1x64xf32>
    %35 = vector.broadcast %34 : vector<1x64xf32> to vector<64x64xf32>
    %36 = arith.mulf %17, %35 : vector<64x64xf32>
    %37 = arith.addf %33, %36 : vector<64x64xf32>
    %cst_24 = arith.constant dense<0.000000e+00> : vector<64xf32>
    %38 = vector.multi_reduction <add>, %37, %cst_24 [1] : vector<64x64xf32> to vector<64xf32>
    %39 = vector.shape_cast %38 : vector<64xf32> to vector<64x1xf32>
    %40 = vector.extract_strided_slice %19 {offsets = [4, 0], sizes = [1, 1], strides = [1, 1]} : vector<5x64xf32> to vector<1x1xf32>
    %41 = vector.broadcast %40 : vector<1x1xf32> to vector<64x1xf32>
    %42 = arith.addf %39, %41 : vector<64x1xf32>
    %43 = vector.extract_strided_slice %19 {offsets = [2, 0], sizes = [1, 64], strides = [1, 1]} : vector<5x64xf32> to vector<1x64xf32>
    %44 = vector.broadcast %43 : vector<1x64xf32> to vector<64x64xf32>
    %45 = arith.mulf %17, %44 : vector<64x64xf32>
    %46 = vector.extract_strided_slice %19 {offsets = [3, 0], sizes = [1, 64], strides = [1, 1]} : vector<5x64xf32> to vector<1x64xf32>
    %47 = vector.broadcast %46 : vector<1x64xf32> to vector<64x64xf32>
    %48 = arith.mulf %17, %47 : vector<64x64xf32>
    %49 = arith.addf %45, %48 : vector<64x64xf32>
    %cst_25 = arith.constant dense<0.000000e+00> : vector<64xf32>
    %50 = vector.multi_reduction <add>, %49, %cst_25 [1] : vector<64x64xf32> to vector<64xf32>
    %51 = vector.shape_cast %50 : vector<64xf32> to vector<64x1xf32>
    %52 = vector.extract_strided_slice %19 {offsets = [4, 1], sizes = [1, 1], strides = [1, 1]} : vector<5x64xf32> to vector<1x1xf32>
    %53 = vector.broadcast %52 : vector<1x1xf32> to vector<64x1xf32>
    %54 = arith.addf %51, %53 : vector<64x1xf32>
    %cst_26 = arith.constant 0.000000e+00 : f32
    %55 = vector.broadcast %cst_26 : f32 to vector<64x1xf32>
    %56 = arith.subf %55, %42 : vector<64x1xf32>
    %57 = math.exp %56 : vector<64x1xf32>
    %cst_27 = arith.constant 1.000000e+00 : f32
    %58 = vector.broadcast %cst_27 : f32 to vector<64x1xf32>
    %59 = arith.addf %58, %57 : vector<64x1xf32>
    %cst_28 = arith.constant 1.000000e+00 : f32
    %60 = vector.broadcast %cst_28 : f32 to vector<64x1xf32>
    %61 = arith.divf %60, %59 : vector<64x1xf32>
    %cst_29 = arith.constant 0.000000e+00 : f32
    %62 = vector.broadcast %cst_29 : f32 to vector<64x1xf32>
    %63 = arith.subf %62, %54 : vector<64x1xf32>
    %64 = math.exp %63 : vector<64x1xf32>
    %cst_30 = arith.constant 1.000000e+00 : f32
    %65 = vector.broadcast %cst_30 : f32 to vector<64x1xf32>
    %66 = arith.addf %65, %64 : vector<64x1xf32>
    %cst_31 = arith.constant 1.000000e+00 : f32
    %67 = vector.broadcast %cst_31 : f32 to vector<64x1xf32>
    %68 = arith.divf %67, %66 : vector<64x1xf32>
    %69 = vector.broadcast %61 : vector<64x1xf32> to vector<64x64xf32>
    %70 = vector.broadcast %24 : vector<1x64xf32> to vector<64x64xf32>
    %71 = arith.mulf %69, %70 : vector<64x64xf32>
    %72 = vector.broadcast %68 : vector<64x1xf32> to vector<64x64xf32>
    %73 = vector.broadcast %26 : vector<1x64xf32> to vector<64x64xf32>
    %74 = arith.mulf %72, %73 : vector<64x64xf32>
    %75 = arith.addf %71, %74 : vector<64x64xf32>
    %76 = arith.mulf %75, %17 : vector<64x64xf32>
    %cst_32 = arith.constant 1.000000e+00 : f32
    %77 = vector.broadcast %cst_32 : f32 to vector<64x64xf32>
    %78 = arith.subf %77, %75 : vector<64x64xf32>
    %79 = arith.mulf %78, %17 : vector<64x64xf32>
    %80 = arith.addf %76, %79 : vector<64x64xf32>
    %81 = arith.truncf %80 : vector<64x64xf32> to vector<64x64xbf16>
    %82 = vector.shape_cast %28 : vector<1x64x64xbf16> to vector<64x64xbf16>
    %cst_33 = arith.constant dense<0.000000e+00> : vector<64x64xf32>
    %83 = tpu.matmul %81, %82, %cst_33 {dimension_numbers = #tpu.dot_dimension_numbers<[1], [0], [0], [1], [0, 0, 1, 1], [], []>} : vector<64x64xbf16>, vector<64x64xbf16>, vector<64x64xf32> -> vector<64x64xf32>
    %84 = arith.truncf %83 : vector<64x64xf32> to vector<64x64xbf16>
    %cst_34 = arith.constant dense<0.000000e+00> : vector<64x64xf32>
    %85 = tpu.matmul %2, %84, %cst_34 {dimension_numbers = #tpu.dot_dimension_numbers<[1], [0], [0], [1], [0, 0, 1, 1], [], []>} : vector<64x64xbf16>, vector<64x64xbf16>, vector<64x64xf32> -> vector<64x64xf32>
    %86 = vector.extract_strided_slice %30 {offsets = [0, 0, 0], sizes = [1, 1, 64], strides = [1, 1, 1]} : vector<1x2x64xf32> to vector<1x1x64xf32>
    %87 = vector.shape_cast %86 : vector<1x1x64xf32> to vector<1x64xf32>
    %88 = vector.broadcast %87 : vector<1x64xf32> to vector<64x64xf32>
    %89 = arith.mulf %85, %88 : vector<64x64xf32>
    %90 = vector.extract_strided_slice %30 {offsets = [0, 1, 0], sizes = [1, 1, 64], strides = [1, 1, 1]} : vector<1x2x64xf32> to vector<1x1x64xf32>
    %91 = vector.shape_cast %90 : vector<1x1x64xf32> to vector<1x64xf32>
    %92 = vector.broadcast %91 : vector<1x64xf32> to vector<64x64xf32>
    %93 = arith.addf %89, %92 : vector<64x64xf32>
    %cst_35 = arith.constant 0.000000e+00 : f32
    %94 = vector.broadcast %cst_35 : f32 to vector<64x64xf32>
    %95 = arith.maximumf %93, %94 : vector<64x64xf32>
    %96 = arith.mulf %75, %95 : vector<64x64xf32>
    %cst_36 = arith.constant 1.000000e+00 : f32
    %97 = vector.broadcast %cst_36 : f32 to vector<64x64xf32>
    %98 = arith.subf %97, %75 : vector<64x64xf32>
    %99 = arith.mulf %98, %17 : vector<64x64xf32>
    %100 = arith.addf %96, %99 : vector<64x64xf32>
    %101 = arith.truncf %100 : vector<64x64xf32> to vector<64x64xbf16>
    %c0_37 = arith.constant 0 : index
    %c0_38 = arith.constant 0 : index
    %c0_39 = arith.constant 0 : index
    %102 = vector.load %arg8[%c0_37, %c0_38, %c0_39] : memref<1x64x32xbf16, #tpu.memory_space<vmem>>, vector<1x64x32xbf16>
    %103 = vector.shape_cast %102 : vector<1x64x32xbf16> to vector<64x32xbf16>
    %cst_40 = arith.constant dense<0.000000e+00> : vector<64x32xf32>
    %104 = tpu.matmul %101, %103, %cst_40 {dimension_numbers = #tpu.dot_dimension_numbers<[1], [0], [0], [1], [0, 0, 1, 1], [], []>} : vector<64x64xbf16>, vector<64x32xbf16>, vector<64x32xf32> -> vector<64x32xf32>
    %105 = arith.truncf %104 : vector<64x32xf32> to vector<64x32xbf16>
    %cst_41 = arith.constant dense<0.000000e+00> : vector<64x32xf32>
    %106 = tpu.matmul %2, %105, %cst_41 {dimension_numbers = #tpu.dot_dimension_numbers<[1], [0], [0], [1], [0, 0, 1, 1], [], []>} : vector<64x64xbf16>, vector<64x32xbf16>, vector<64x32xf32> -> vector<64x32xf32>
    %c0_42 = arith.constant 0 : index
    %c0_43 = arith.constant 0 : index
    %c0_44 = arith.constant 0 : index
    %107 = vector.load %arg9[%c0_42, %c0_43, %c0_44] : memref<1x1x32xf32, #tpu.memory_space<vmem>>, vector<1x1x32xf32>
    %108 = vector.shape_cast %107 : vector<1x1x32xf32> to vector<1x32xf32>
    %109 = vector.broadcast %108 : vector<1x32xf32> to vector<64x32xf32>
    %110 = arith.addf %106, %109 : vector<64x32xf32>
    %111 = tpu.iota {dimensions = array<i32: 1>} : vector<1x32xi32>
    %c16_i32 = arith.constant 16 : i32
    %112 = vector.broadcast %c16_i32 : i32 to vector<1x32xi32>
    %113 = arith.cmpi slt, %111, %112 : vector<1x32xi32>
    %114 = arith.extui %113 : vector<1x32xi1> to vector<1x32xi32>
    %115 = arith.sitofp %114 : vector<1x32xi32> to vector<1x32xf32>
    %cst_45 = arith.constant 1.000000e+00 : f32
    %116 = vector.broadcast %cst_45 : f32 to vector<1x32xf32>
    %117 = arith.subf %116, %115 : vector<1x32xf32>
    %c16_i32_46 = arith.constant 16 : i32
    %118 = vector.broadcast %c16_i32_46 : i32 to vector<1x32xi32>
    %119 = arith.cmpi slt, %111, %118 : vector<1x32xi32>
    %cst_47 = arith.constant -1.000000e+30 : f32
    %120 = vector.shape_cast %119 : vector<1x32xi1> to vector<1x32xi1>
    %121 = vector.broadcast %120 : vector<1x32xi1> to vector<64x32xi1>
    %122 = vector.broadcast %cst_47 : f32 to vector<64x32xf32>
    %123 = arith.select %121, %110, %122 : vector<64x32xi1>, vector<64x32xf32>
    %cst_48 = arith.constant dense<0xFF800000> : vector<64xf32>
    %124 = vector.multi_reduction <maximumf>, %123, %cst_48 [1] : vector<64x32xf32> to vector<64xf32>
    %125 = vector.shape_cast %124 : vector<64xf32> to vector<64x1xf32>
    %c16_i32_49 = arith.constant 16 : i32
    %126 = vector.broadcast %c16_i32_49 : i32 to vector<1x32xi32>
    %127 = arith.cmpi slt, %111, %126 : vector<1x32xi32>
    %cst_50 = arith.constant -1.000000e+30 : f32
    %128 = vector.shape_cast %127 : vector<1x32xi1> to vector<1x32xi1>
    %129 = vector.broadcast %128 : vector<1x32xi1> to vector<64x32xi1>
    %130 = vector.broadcast %cst_50 : f32 to vector<64x32xf32>
    %131 = arith.select %129, %130, %110 : vector<64x32xi1>, vector<64x32xf32>
    %cst_51 = arith.constant dense<0xFF800000> : vector<64xf32>
    %132 = vector.multi_reduction <maximumf>, %131, %cst_51 [1] : vector<64x32xf32> to vector<64xf32>
    %133 = vector.shape_cast %132 : vector<64xf32> to vector<64x1xf32>
    %134 = vector.broadcast %125 : vector<64x1xf32> to vector<64x32xf32>
    %135 = vector.broadcast %115 : vector<1x32xf32> to vector<64x32xf32>
    %136 = arith.mulf %134, %135 : vector<64x32xf32>
    %137 = vector.broadcast %133 : vector<64x1xf32> to vector<64x32xf32>
    %138 = vector.broadcast %117 : vector<1x32xf32> to vector<64x32xf32>
    %139 = arith.mulf %137, %138 : vector<64x32xf32>
    %140 = arith.addf %136, %139 : vector<64x32xf32>
    %141 = arith.subf %110, %140 : vector<64x32xf32>
    %142 = math.exp %141 : vector<64x32xf32>
    %143 = vector.broadcast %115 : vector<1x32xf32> to vector<64x32xf32>
    %144 = arith.mulf %142, %143 : vector<64x32xf32>
    %cst_52 = arith.constant dense<0.000000e+00> : vector<64xf32>
    %145 = vector.multi_reduction <add>, %144, %cst_52 [1] : vector<64x32xf32> to vector<64xf32>
    %146 = vector.shape_cast %145 : vector<64xf32> to vector<64x1xf32>
    %147 = vector.broadcast %117 : vector<1x32xf32> to vector<64x32xf32>
    %148 = arith.mulf %142, %147 : vector<64x32xf32>
    %cst_53 = arith.constant dense<0.000000e+00> : vector<64xf32>
    %149 = vector.multi_reduction <add>, %148, %cst_53 [1] : vector<64x32xf32> to vector<64xf32>
    %150 = vector.shape_cast %149 : vector<64xf32> to vector<64x1xf32>
    %151 = math.log %146 : vector<64x1xf32>
    %152 = vector.broadcast %151 : vector<64x1xf32> to vector<64x32xf32>
    %153 = vector.broadcast %115 : vector<1x32xf32> to vector<64x32xf32>
    %154 = arith.mulf %152, %153 : vector<64x32xf32>
    %155 = math.log %150 : vector<64x1xf32>
    %156 = vector.broadcast %155 : vector<64x1xf32> to vector<64x32xf32>
    %157 = vector.broadcast %117 : vector<1x32xf32> to vector<64x32xf32>
    %158 = arith.mulf %156, %157 : vector<64x32xf32>
    %159 = arith.addf %154, %158 : vector<64x32xf32>
    %160 = arith.subf %110, %140 : vector<64x32xf32>
    %161 = arith.subf %160, %159 : vector<64x32xf32>
    %c0_54 = arith.constant 0 : index
    %c0_55 = arith.constant 0 : index
    %c0_56 = arith.constant 0 : index
    %162 = vector.load %arg10[%c0_54, %c0_55, %c0_56] : memref<1x64x32xf32, #tpu.memory_space<vmem>>, vector<1x64x32xf32>
    %163 = vector.shape_cast %162 : vector<1x64x32xf32> to vector<64x32xf32>
    %164 = vector.shape_cast %161 : vector<64x32xf32> to vector<1x64x32xf32>
    tpu.vector_store %arg10[%c0_54, %c0_55, %c0_56], %164 {strides = array<i32>} : memref<1x64x32xf32, #tpu.memory_space<vmem>>, vector<1x64x32xf32>,
    return
  }
  func.func @transform_0(%arg0: i32) -> (i32, i32) {
    %c0_i32 = arith.constant 0 : i32
    %c0_i32_0 = arith.constant 0 : i32
    %c0_i32_1 = arith.constant 0 : i32
    return %c0_i32, %c0_i32_0 : i32, i32
  }
  func.func @transform_1(%arg0: i32) -> (i32, i32, i32) {
    %c0_i32 = arith.constant 0 : i32
    %c0_i32_0 = arith.constant 0 : i32
    %c0_i32_1 = arith.constant 0 : i32
    return %arg0, %c0_i32, %c0_i32_0 : i32, i32, i32
  }
  func.func @transform_2(%arg0: i32) -> (i32, i32, i32) {
    %c0_i32 = arith.constant 0 : i32
    %c0_i32_0 = arith.constant 0 : i32
    %c0_i32_1 = arith.constant 0 : i32
    return %arg0, %c0_i32, %c0_i32_0 : i32, i32, i32
  }
  func.func @transform_3(%arg0: i32) -> (i32, i32, i32) {
    %c0_i32 = arith.constant 0 : i32
    %c0_i32_0 = arith.constant 0 : i32
    %c0_i32_1 = arith.constant 0 : i32
    return %arg0, %c0_i32, %c0_i32_0 : i32, i32, i32
  }
  func.func @transform_4(%arg0: i32) -> (i32, i32, i32) {
    %c0_i32 = arith.constant 0 : i32
    %c0_i32_0 = arith.constant 0 : i32
    %c0_i32_1 = arith.constant 0 : i32
    return %arg0, %c0_i32, %c0_i32_0 : i32, i32, i32
  }
  func.func @transform_5(%arg0: i32) -> (i32, i32, i32, i32) {
    %c0_i32 = arith.constant 0 : i32
    %c0_i32_0 = arith.constant 0 : i32
    %c0_i32_1 = arith.constant 0 : i32
    %c0_i32_2 = arith.constant 0 : i32
    return %arg0, %c0_i32, %c0_i32_0, %c0_i32_1 : i32, i32, i32, i32
  }
  func.func @transform_6(%arg0: i32) -> (i32, i32, i32, i32) {
    %c0_i32 = arith.constant 0 : i32
    %c0_i32_0 = arith.constant 0 : i32
    %c0_i32_1 = arith.constant 0 : i32
    %c0_i32_2 = arith.constant 0 : i32
    return %arg0, %c0_i32, %c0_i32_0, %c0_i32_1 : i32, i32, i32, i32
  }
  func.func @transform_7(%arg0: i32) -> (i32, i32, i32) {
    %c0_i32 = arith.constant 0 : i32
    %c0_i32_0 = arith.constant 0 : i32
    %c0_i32_1 = arith.constant 0 : i32
    return %arg0, %c0_i32, %c0_i32_0 : i32, i32, i32
  }
  func.func @transform_8(%arg0: i32) -> (i32, i32, i32) {
    %c0_i32 = arith.constant 0 : i32
    %c0_i32_0 = arith.constant 0 : i32
    %c0_i32_1 = arith.constant 0 : i32
    return %arg0, %c0_i32, %c0_i32_0 : i32, i32, i32
  }
  func.func @transform_9(%arg0: i32) -> (i32, i32, i32) {
    %c0_i32 = arith.constant 0 : i32
    %c0_i32_0 = arith.constant 0 : i32
    %c0_i32_1 = arith.constant 0 : i32
    return %arg0, %c0_i32, %c0_i32_0 : i32, i32, i32
  }
}

</mosaic_0001>

<bundles_post_ra>
// kernel: tpu_custom_call.1
= control target key start
LH: loop header
LB: loop body
LE: loop exit
PB: predicated region body
PF: predicated region fallthrough
CT: control target
= control target key end

     0   :  { %s3346_s0 = inlined_call_operand.hbm [shape: bf16[64,64], index: 0, kind: input, shape index: {}]   ;;  %s3347_s1 = inlined_call_operand.vmem [shape: bf16[2,64,64], index: 1, kind: input, shape index: {}]   ;;  %s3348_s2 = inlined_call_operand.hbm [shape: bf16[2,64,64], index: 2, kind: input, shape index: {}]   ;;  %s3349_s3 = inlined_call_operand.hbm [shape: f32[2,2,64], index: 3, kind: input, shape index: {}]   ;;  %s3350_s4 = inlined_call_operand.vmem [shape: f32[2,5,64], index: 4, kind: input, shape index: {}]   ;;  %s3351_s5 = inlined_call_operand.vmem [shape: bf16[2,1,64,64], index: 5, kind: input, shape index: {}]   ;;  %s3352_s6 = inlined_call_operand.vmem [shape: f32[2,1,2,64], index: 6, kind: input, shape index: {}]   ;;  %s3353_s7 = inlined_call_operand.vmem [shape: bf16[2,64,32], index: 7, kind: input, shape index: {}]   ;;  %s3354_s8 = inlined_call_operand.vmem [shape: f32[2,1,32], index: 8, kind: input, shape index: {}]   ;;  %s3355_s9 = inlined_call_operand.vmem [shape: f32[2,64,32], index: 9, kind: output, shape index: {}]  }
   0x1   :  { %3361 = sst [smem:[#allocation9_spill]] %s3348_s2 }
   0x2   :  { %14 = vsyncpa [#allocation3], 0 }
   0x3   :  { %15 = vsyncpa [#allocation5], 0 }
   0x4   :  { %17 = vsyncpa [#allocation5 + $0x1], 0  ;;  %s2612_s30 = smov 0   ;;  %s2614_s10 = smov 0  }
   0x5   :  { %s2616_s11 = smov 0   ;;  %s2618_s12 = smov 0  }
   0x6 LB: > { %s2633_s13 = sadd.s32 1, %s2552_s12   ;;  %s77_s14 = sadd.s32 1, %s2548_s11  ;;  %s2552_s12 = sphi %s2618_s12, %s3376_s12   ;;  %s2548_s11 = sphi %s2616_s11, %s3375_s11   ;;  %s2544_s10 = sphi %s2614_s10, %s3374_s10   ;;  %s2540_s30 = sphi %s2612_s30, %s3373_s30  }
   0x7   : > { %s74_s15 = ssub.s32 %s2552_s12, %s2633_s13  ;;  %p84_p0 = scmp.ne.s32.totalorder %s2548_s11, %s2544_s10 }
   0x8   : > { %p75_p1 = scmp.eq.s32.totalorder %s74_s15, 0  ;;  %p85_p2 = scmp.eq.s32.totalorder %s2552_s12, 0 }
   0x9   : > { %p2245_p4 = scmp.lt.s32.totalorder %s2552_s12, 2  ;;  %s317_s17 = sand.u32 1, %s2552_s12  }
   0xa   : > { %s2642_s16 = scalar_select %p75_p1, %s2548_s11, %s77_s14  }
   0xb   : > { %p86_p3 = por %p85_p2, %p84_p0  ;;  %s319_s18 = sand.u32 1, %s2548_s11  }
   0xc   : > { %s2008_s19 = sshll.u32 %s319_s18, 5  ;;  %s2076_s20 = sshll.u32 %s2552_s12, 9 }
   0xd   : > { %s3362_s2 = sld [smem:[#allocation9_spill]]  ;;  %s321_s24 = scalar_lea.vmem [#allocation4], %s2008_s19 }
   0xe   : > { %s328_s25 = sshll.u32 %s321_s24, 4  ;;  %p2655_p5 = pnand %p2245_p4, %p86_p3  ;;  %s2659_s25 = int_to_ptr.vmem [resolvable:$true] %s328_s25 }
   0xf   : > { %s2661_s27 = scalar_lea.sflag [#allocation5], %s317_s17 }
  0x10   : > { %p3358_p7 = pneg %p2655_p5 }
  0x13   : > { %s2653_s23 = scalar_lea.hbm %s3362_s2, %s2076_s20  ;;  %s2437_s15 = scalar_lea.hbm %s3362_s2, 1024 }
  0x14   : > { %s2432_s28 = scalar_lea.hbm %s2653_s23, 512  ;;  %p2438_p10 = scmp.lt.s32.totalorder %s2653_s23, %s3362_s2 }
  0x15   : > { %p2433_p6 = scmp.ne.s32.totalorder %s2653_s23, %s2432_s28  ;;  %p2439_p11 = scmp.lt.s32.totalorder %s2437_s15, %s2432_s28 }
  0x17   : > { %p2435_p8 = pnand %p3358_p7, %p2433_p6  ;;  %p2440_p12 = por %p2439_p11, %p2438_p10 }
  0x19   : > { %p2436_p9 = pneg %p2435_p8 }
  0x1b   : > { %p2441_p13 = pnand %p2440_p12, %p2436_p9 }
  0x1d   : > { %2444 = shalt.err (!%p2441_p13)
}
  0x1e   : > { %s2445_s17 = scalar_lea.vmem %s2659_s25, 512  ;;  %s2554_s21 = smov [#allocation4]  }
  0x1f   : > { %p2446_p0 = scmp.ne.s32.totalorder %s2659_s25, %s2445_s17  ;;  %s2450_s22 = sshll.u32 %s2554_s21, 4  ;;  %s2451_s22 = int_to_ptr.vmem [resolvable:$false] %s2450_s22 }
  0x20   : > { %s2452_s24 = scalar_lea.vmem %s2451_s22, 1024  ;;  %p2453_p3 = scmp.lt.s32.totalorder %s2659_s25, %s2451_s22 }
  0x21   : > { %p2448_p1 = pnand %p2446_p0, %p3358_p7  ;;  %p2454_p4 = scmp.lt.s32.totalorder %s2452_s24, %s2445_s17 }
  0x23   : > { %p2449_p2 = pneg %p2448_p1  ;;  %p2455_p6 = por %p2454_p4, %p2453_p3 }
  0x25   : > { %p2456_p8 = pnand %p2455_p6, %p2449_p2 }
  0x27   : > { %2459 = shalt.err (!%p2456_p8)
}
  0x28   : > { %s3356_s28 = smov 64   ;;  %s3357_s29 = smov 4  }
  0x29   : > { %2240 = dma.hbm_to_vmem [thread:$0]  (!%p2655_p5), %s2653_s23, 512, %s2659_s25, %s2661_s27, %s3356_s28, %s3356_s28, %s3357_s29  }
  0x2a   : > { %s2692_s14 = sadd.s32 4294967295, %s2552_s12   ;;  %p90_p9 = scmp.ne.s32.totalorder %s2544_s10, %s2540_s30 }
  0x2b   : > { %p3359_p10 = scmp.eq.s32.totalorder %s2692_s14, 0  ;;  %p2005_p11 = scmp.ge.s32.totalorder %s2552_s12, 1 }
  0x2c   : > { %p283_p12 = scmp.lt.s32.totalorder %s2552_s12, 3  ;;  %s2557_s23 = smov [#allocation2]  }
  0x2d   : > { %p2701_p13 = por %p3359_p10, %p90_p9  ;;  %s295_s25 = sshll.u32 %s2557_s23, 4  ;;  %s296_s25 = int_to_ptr.vmem [resolvable:$true] %s295_s25 }
  0x2e   : > { %p2705_p0 = pnand %p2005_p11, %p283_p12  ;;  %s2011_s20 = sshll.u32 %s319_s18, 1 }
  0x2f   : > { %s3364_s15 = scalar_select %p2701_p13, 1, 0 }
  0x30   : > { %p2233_p1 = pneg %p2705_p0  ;;  %s2012_s30 = sshll.u32 %s2552_s12, 5 }
  0x31   : > { %s342_s17 = scalar_lea.vmem [#allocation6], %s2011_s20  ;;  %s2719_s28 = scalar_lea.hbm %s3349_s3, %s2012_s30 }
  0x32   : > { %s349_s21 = sshll.u32 %s342_s17, 4  ;;  %p2234_p2 = pnand %p2233_p1, %p3359_p10  ;;  %s2721_s21 = int_to_ptr.vmem [resolvable:$true] %s349_s21 }
  0x33   : > { %s2471_s29 = scalar_lea.vmem %s296_s25, 512  ;;  %p2479_p9 = scmp.lt.s32.totalorder %s296_s25, %s296_s25 }
  0x34   : > { %p2462_p3 = pneg %p2234_p2  ;;  %p2472_p4 = scmp.ne.s32.totalorder %s296_s25, %s2471_s29 }
  0x35   : > { %p2480_p11 = scmp.lt.s32.totalorder %s2471_s29, %s2471_s29 }
  0x36   : > { %p2474_p6 = pnand %p2472_p4, %p2462_p3 }
  0x37   : > { %p2481_p12 = por %p2480_p11, %p2479_p9 }
  0x38   : > { %p2475_p8 = pneg %p2474_p6 }
  0x3a   : > { %p2482_p7 = pnand %p2481_p12, %p2475_p8 }
  0x3c   : > { %2485 = shalt.err (!%p2482_p7)
}
  0x3d   : > { %s3366_s12 = smov 4   ;;  %s3367_s18 = smov 64  }
  0x3e   : > { %2236 = dma.hbm_to_vmem [thread:$0]  (!%p2234_p2), %s3346_s0, 512, %s296_s25, [#allocation3], %s3367_s18, %s3367_s18, %s3366_s12  }
  0x3f   : > { %s2486_s30 = scalar_lea.hbm %s2719_s28, 32  ;;  %p3368_p3 = pneg %p2655_p5 }
  0x40   : > { %p2487_p1 = scmp.ne.s32.totalorder %s2719_s28, %s2486_s30  ;;  %s2491_s22 = scalar_lea.hbm %s3349_s3, 64 }
  0x41   : > { %p2492_p7 = scmp.lt.s32.totalorder %s2719_s28, %s3349_s3  ;;  %p2493_p8 = scmp.lt.s32.totalorder %s2491_s22, %s2486_s30 }
  0x42   : > { %p2489_p4 = pnand %p2487_p1, %p3368_p3 }
  0x43   : > { %p2494_p9 = por %p2493_p8, %p2492_p7 }
  0x44   : > { %p2490_p6 = pneg %p2489_p4 }
  0x46   : > { %p2495_p11 = pnand %p2494_p9, %p2490_p6 }
  0x48   : > { %2498 = shalt.err (!%p2495_p11)
}
  0x49   : > { %s2499_s25 = scalar_lea.vmem %s2721_s21, 32  ;;  %p3369_p12 = pmov %p3368_p3 }
  0x4a   : > { %p2500_p2 = scmp.ne.s32.totalorder %s2721_s21, %s2499_s25  ;;  %s2558_s12 = smov [#allocation6]  }
  0x4b   : > { %s2504_s18 = sshll.u32 %s2558_s12, 4  ;;  %s2505_s18 = int_to_ptr.vmem [resolvable:$false] %s2504_s18 }
  0x4c   : > { %p2502_p1 = pnand %p2500_p2, %p3369_p12  ;;  %s2506_s23 = scalar_lea.vmem %s2505_s18, 64 }
  0x4d   : > { %p2507_p4 = scmp.lt.s32.totalorder %s2721_s21, %s2505_s18  ;;  %p2508_p10 = scmp.lt.s32.totalorder %s2506_s23, %s2499_s25 }
  0x4e   : > { %p2503_p3 = pneg %p2502_p1 }
  0x4f   : > { %p2509_p13 = por %p2508_p10, %p2507_p4 }
  0x51   : > { %p2510_p7 = pnand %p2509_p13, %p2503_p3 }
  0x53   : > { %2513 = shalt.err (!%p2510_p7)
}
  0x54   : > { %2243 = dma.hbm_to_vmem [thread:$0]  (!%p2655_p5), %s2719_s28, 32, %s2721_s21, %s2661_s27  }
  0x55   : > { %394 = sbr.rel (%p2705_p0) target bundleno = 2119 (0x847), region = 56  ;;  %p3370_p6 = scmp.eq.s32.totalorder (!%p2705_p0), %s2692_s14, 0 }
  0x5a   : > { %2531 = dma.done.wait (%p3370_p6), [#allocation3], 512   ;;  %p3371_p8 = pmov %p3370_p6 }
  0x5b   : > { %s400_s2 = sand.u32 1, %s2692_s14   ;;  %s402_s20 = sand.u32 1, %s2544_s10  }
  0x5c   : > { %2533 = vsyncadd (%p3371_p8), [#allocation3], 4294966784  ;;  %s2015_s26 = sshll.u32 %s402_s20, 5  ;;  %s401_s30 = scalar_lea.sflag [#allocation5], %s400_s2 }
  0x5d   : > { %s404_s29 = scalar_lea.vmem [#allocation4], %s2015_s26  ;;  %p3372_p5 = scmp.ne.s32.totalorder %s3364_s15, 0 }
  0x5f   : > { %2535 = dma.done.wait (%p3372_p5), %s401_s30, 544  }
  0x60   : > { %2537 = vsyncadd (%p3372_p5), %s401_s30, 4294966752  ;;  %v2297_v0 = vld [vmem:[%s404_s29 + $0x18] sm:$0xff]   ;;  %v2298_v1 = vld [vmem:[%s404_s29 + $0x10] sm:$0xff]   ;;  %vm579_vm0 = vcmask 523264   ;;  %p479_p10 = scmp.lt.s32.totalorder %s2692_s14, 1  ;;  %v759_v24 = vlaneseq  ;;  %s2016_s25 = sshll.u32 %s402_s20, 1 }
  0x61   : > { %2129 = vmatprep.subr.bf16.mxu0 %v2297_v0  ;;  %v2299_v2 = vld [vmem:[%s404_s29 + $0x8] sm:$0xff]   ;;  %v2301_v3 = vld [vmem:[#allocation2] sm:$0xff]   ;;  %v2303_v6 = vld [vmem:[#allocation2 + $0x10] sm:$0xff]   ;;  %s413_s12 = scalar_lea.vmem [#allocation6], %s2016_s25  ;;  %vm1595_vm3 = vcmask 261120  }
  0x62   : > { %2130 = vmatpush3.bf16.msra.mxu0 %v2297_v0  ;;  %2137 = vmatprep.mubr.msk.bf16.mxu0 %vm579_vm0, %v2301_v3  ;;  %v2300_v4 = vld [vmem:[%s404_s29] sm:$0xff]   ;;  %v2302_v5 = vld [vmem:[#allocation2 + $0x8] sm:$0xff]   ;;  %v2304_v7 = vld [vmem:[#allocation2 + $0x18] sm:$0xff]   ;;  %s3378_s14 = smov (!%p479_p10, %s2692_s14), 1  ;;  %v760_v25 = vshrl.u32 %v759_v24, 7 }
  0x63   : > { %2131 = vmatprep.subr.bf16.mxu0 %v2298_v1  ;;  %s2775_s27 = sshll.u32 %s3378_s14, 5  ;;  %s2019_s21 = sshll.u32 %s3378_s14, 3  ;;  %v758_v30 = vld [vmem:[%s413_s12] sm:$0x3] }
  0x64   : > { %s2781_s19 = scalar_lea.vmem %s3347_s1, %s2775_s27  ;;  %v865_v26 = vsub.s32 4, %v760_v25  ;;  %s487_s24 = scalar_lea.vmem %s3350_s4, %s2019_s21  ;;  %v2814_v29 = vsub.s32 0, %v760_v25  ;;  %v2816_v31 = vsub.s32 1, %v760_v25  ;;  %v877_v35 = vsub.s32 2, %v760_v25 }
  0x65   : > { %v2784_v8 = vld [vmem:[%s2781_s19] sm:$0xff]   ;;  %v2789_v21 = vld [vmem:[%s2781_s19 + $0x8] sm:$0xff]   ;;  %v2792_v22 = vld [vmem:[%s2781_s19 + $0x10] sm:$0xff]   ;;  %v889_v36 = vsub.s32 3, %v760_v25  ;;  %s492_s2 = scalar_lea.vmem %s3351_s5, %s2775_s27  ;;  %s501_s30 = scalar_lea.vmem %s3353_s7, %s2775_s27 }
  0x66   : > { %2132 = vmatpush3.bf16.msra.mxu0 %v2298_v1  ;;  %2153 = vmatprep.mubr.msk.bf16.mxu1 %vm579_vm0, %v2784_v8  ;;  %v2799_v23 = vld [vmem:[%s2781_s19 + $0x18] sm:$0xff]   ;;  %v791_v27 = vld [vmem:[%s487_s24] sm:$0x1f]  ;;  %v762_v32 = vrot.slane %v758_v30, %v2814_v29  ;;  %v2820_v33 = vrot.slane %v758_v30, %v2816_v31  ;;  %s2022_s29 = sshll.u32 %s3378_s14, 1  ;;  %s504_s22 = scalar_lea.vmem %s3354_s8, %s3378_s14 }
  0x67   : > { %2133 = vmatprep.subr.bf16.mxu0 %v2299_v2  ;;  %v2810_v28 = vrot.slane %v791_v27, %v865_v26  ;;  %v2824_v41 = vrot.slane %v791_v27, %v2814_v29  ;;  %v2827_v43 = vrot.slane %v791_v27, %v2816_v31  ;;  %v2829_v44 = vrot.slane %v791_v27, %v877_v35  ;;  %s496_s21 = scalar_lea.vmem %s3352_s6, %s2022_s29 }
  0x68   : > { %v2831_v45 = vrot.slane %v791_v27, %v889_v36 }
  0x6a   : > { %2134 = vmatpush3.bf16.msra.mxu0 %v2299_v2 }
  0x6b   : > { %2135 = vmatprep.subr.bf16.mxu0 %v2300_v4 }
  0x6e   : > { %2136 = vmatpush3.bf16.msra.mxu0 %v2300_v4 }
  0x71   : > { %2138 = vmatmul.mubr.msk.bf16.vlgmr.msra.gmra.mxu0 %vm579_vm0, %v2302_v5 }
  0x72   : > { %2141 = vmatprep.mubr.msk.bf16.mxu0 %vm579_vm0, %v2303_v6 }
  0x79   : > { %2142 = vmatmul.mubr.msk.bf16.gmra.mxu0 %vm579_vm0, %v2304_v7 }
 0x131   : > { %v2139_v9 = vpop.f32.mrf.mxu0 }
 0x133   : > { %v626_v10 = vpop.f32.mrf.mxu0 }
 0x135   : > { %v2140_v11 = vpop.f32.mrf.mxu0 }
 0x136   : > { %v658_v19 = vpack.c.bf16 %v2140_v11, %v2139_v9 }
 0x137   : > { %v629_v12 = vpop.f32.mrf.mxu0 }
 0x138   : > { %v657_v20 = vpack.c.bf16 %v629_v12, %v626_v10 }
 0x139   : > { %v2143_v13 = vpop.f32.mrf.mxu0 }
 0x13b   : > { %v642_v14 = vpop.f32.mrf.mxu0 }
 0x13d   : > { %v2144_v15 = vpop.f32.mrf.mxu0 }
 0x13e   : > { %v660_v16 = vpack.c.bf16 %v2144_v15, %v2143_v13 }
 0x13f   : > { %v645_v17 = vpop.f32.mrf.mxu0 }
 0x140   : > { %v659_v18 = vpack.c.bf16 %v645_v17, %v642_v14  ;;  %2145 = vmatprep.subr.bf16.mxu1 %v660_v16 }
 0x141   : > { %2146 = vmatpush3.bf16.msra.mxu1 %v660_v16 }
 0x142   : > { %2147 = vmatprep.subr.bf16.mxu1 %v659_v18 }
 0x145   : > { %2148 = vmatpush3.bf16.msra.mxu1 %v659_v18 }
 0x146   : > { %2149 = vmatprep.subr.bf16.mxu1 %v658_v19 }
 0x149   : > { %2150 = vmatpush3.bf16.msra.mxu1 %v658_v19 }
 0x14a   : > { %2151 = vmatprep.subr.bf16.mxu1 %v657_v20 }
 0x14d   : > { %2152 = vmatpush3.bf16.msra.mxu1 %v657_v20 }
 0x150   : > { %2154 = vmatmul.mubr.msk.bf16.vlgmr.msra.gmra.mxu1 %vm579_vm0, %v2789_v21 }
 0x151   : > { %2157 = vmatprep.mubr.msk.bf16.mxu1 %vm579_vm0, %v2792_v22 }
 0x158   : > { %2158 = vmatmul.mubr.msk.bf16.gmra.mxu1 %vm579_vm0, %v2799_v23 }
 0x159   : > { %2185 = vmatprep.mubr.msk.bf16.mxu1 %vm579_vm0, %v2784_v8 }
 0x210   : > { %v2155_v34 = vpop.f32.mrf.mxu1 }
 0x211   : > { %v765_v37 = vmul.f32 %v2155_v34, %v762_v32 }
 0x212   : > { %v727_v38 = vpop.f32.mrf.mxu1 }
 0x213   : > { %v777_v39 = vadd.f32 %v2820_v33, %v765_v37  ;;  %v763_v40 = vmul.f32 %v762_v32, %v727_v38 }
 0x214   : > { %v2156_v42 = vpop.f32.mrf.mxu1 }
 0x215   : > { %v2833_v46 = vmax.f32 %v777_v39, 0.0  ;;  %v775_v47 = vadd.f32 %v2820_v33, %v763_v40  ;;  %v766_v48 = vmul.f32 %v2156_v42, %v762_v32 }
 0x216   : > { %v730_v49 = vpop.f32.mrf.mxu1 }
 0x217   : > { %v2836_v50 = vmax.f32 %v775_v47, 0.0  ;;  %v778_v51 = vadd.f32 %v2820_v33, %v766_v48  ;;  %v764_v52 = vmul.f32 %v762_v32, %v730_v49  ;;  %v813_v53 = vmul.f32 %v2824_v41, %v2833_v46 }
 0x218   : > { %v825_v54 = vmul.f32 %v2827_v43, %v2833_v46  ;;  %v2159_v55 = vpop.f32.mrf.mxu1  ;;  %v881_v56 = vmul.f32 %v2829_v44, %v2833_v46  ;;  %v893_v57 = vmul.f32 %v2831_v45, %v2833_v46 }
 0x219   : > { %v2847_v58 = vmax.f32 %v778_v51, 0.0  ;;  %v776_v59 = vadd.f32 %v2820_v33, %v764_v52  ;;  %v879_v60 = vmul.f32 %v2829_v44, %v2836_v50  ;;  %v891_v61 = vmul.f32 %v2831_v45, %v2836_v50 }
 0x21a   : > { %v833_v62 = vadd.f32 %v825_v54, %v813_v53  ;;  %v769_v63 = vmul.f32 %v2159_v55, %v762_v32  ;;  %v901_v0 = vadd.f32 %v893_v57, %v881_v56  ;;  %v743_v1 = vpop.f32.mrf.mxu1  ;;  %v811_v5 = vmul.f32 %v2824_v41, %v2836_v50 }
 0x21b   : > { %v899_v2 = vadd.f32 %v891_v61, %v879_v60  ;;  %v767_v3 = vmul.f32 %v762_v32, %v743_v1  ;;  %v814_v4 = vmul.f32 %v2824_v41, %v2847_v58  ;;  %v2858_v6 = vmax.f32 %v776_v59, 0.0 }
 0x21c   : > { %v845_v7 = vsel %vm579_vm0, %v833_v62, 0.0  ;;  %v781_v9 = vadd.f32 %v2820_v33, %v769_v63  ;;  %v826_v10 = vmul.f32 %v2827_v43, %v2847_v58  ;;  %v2160_v11 = vpop.f32.mrf.mxu1  ;;  %v823_v15 = vmul.f32 %v2827_v43, %v2836_v50 }
 0x21d   : > { %846 = vadd.xlane.f32.xlu0 %v845_v7  ;;  %v907_v12 = vsel %vm579_vm0, %v899_v2, 0.0  ;;  %v779_v13 = vadd.f32 %v2820_v33, %v767_v3  ;;  %v770_v14 = vmul.f32 %v2160_v11, %v762_v32  ;;  %v882_v18 = vmul.f32 %v2829_v44, %v2847_v58 }
 0x21e   : > { %908 = vadd.xlane.f32.xlu1 %v907_v12  ;;  %v2868_v16 = vmax.f32 %v781_v9, 0.0  ;;  %v834_v17 = vadd.f32 %v826_v10, %v814_v4  ;;  %v894_v19 = vmul.f32 %v2831_v45, %v2847_v58  ;;  %v746_v20 = vpop.f32.mrf.mxu1  ;;  %v913_v25 = vsel %vm579_vm0, %v901_v0, 0.0 }
 0x21f   : > { %v782_v26 = vadd.f32 %v2820_v33, %v770_v14  ;;  %v768_v27 = vmul.f32 %v762_v32, %v746_v20  ;;  %v831_v34 = vadd.f32 %v823_v15, %v811_v5  ;;  %v812_v35 = vmul.f32 %v2824_v41, %v2858_v6 }
 0x220   : > { %v848_v30 = vsel %vm579_vm0, %v834_v17, 0.0  ;;  %v824_v36 = vmul.f32 %v2827_v43, %v2858_v6  ;;  %v902_v38 = vadd.f32 %v894_v19, %v882_v18  ;;  %v880_v40 = vmul.f32 %v2829_v44, %v2858_v6 }
 0x221   : > { %914 = vadd.xlane.f32.xlu0 %v913_v25  ;;  %v2881_v37 = vmax.f32 %v782_v26, 0.0  ;;  %v780_v39 = vadd.f32 %v2820_v33, %v768_v27  ;;  %v2886_v42 = vmax.f32 %v779_v13, 0.0  ;;  %v892_v32 = vmul.f32 %v2831_v45, %v2858_v6 }
 0x222   : > { %849 = vadd.xlane.f32.xlu1 %v848_v30  ;;  %v817_v47 = vmul.f32 %v2824_v41, %v2868_v16  ;;  %v829_v51 = vmul.f32 %v2827_v43, %v2868_v16  ;;  %v839_v52 = vsel %vm579_vm0, %v831_v34, 0.0  ;;  %v832_v53 = vadd.f32 %v824_v36, %v812_v35 }
 0x223   : > { %v2892_v48 = vmax.f32 %v780_v39, 0.0  ;;  %v818_v49 = vmul.f32 %v2824_v41, %v2881_v37  ;;  %v830_v33 = vmul.f32 %v2827_v43, %v2881_v37  ;;  %v916_v54 = vsel %vm579_vm0, %v902_v38, 0.0 }
 0x224   : > { %v900_v55 = vadd.f32 %v892_v32, %v880_v40  ;;  %v837_v56 = vadd.f32 %v829_v51, %v817_v47  ;;  %v815_v57 = vmul.f32 %v2824_v41, %v2886_v42  ;;  %v827_v59 = vmul.f32 %v2827_v43, %v2886_v42 }
 0x225   : > { %840 = vadd.xlane.f32.xlu0 %v839_v52  ;;  %v838_v60 = vadd.f32 %v830_v33, %v818_v49  ;;  %v816_v61 = vmul.f32 %v2824_v41, %v2892_v48  ;;  %v828_v62 = vmul.f32 %v2827_v43, %v2892_v48  ;;  %v842_v63 = vsel %vm579_vm0, %v832_v53, 0.0 }
 0x226   : > { %917 = vadd.xlane.f32.xlu1 %v916_v54  ;;  %v910_v0 = vsel %vm579_vm0, %v900_v55, 0.0  ;;  %v857_v1 = vsel %vm579_vm0, %v837_v56, 0.0  ;;  %v835_v2 = vadd.f32 %v827_v59, %v815_v57  ;;  %v883_v3 = vmul.f32 %v2829_v44, %v2886_v42 }
 0x227   : > { %v895_v4 = vmul.f32 %v2831_v45, %v2886_v42  ;;  %v860_v41 = vsel %vm579_vm0, %v838_v60, 0.0  ;;  %v836_v5 = vadd.f32 %v828_v62, %v816_v61  ;;  %v884_v43 = vmul.f32 %v2829_v44, %v2892_v48 }
 0x228   : > { %v896_v7 = vmul.f32 %v2831_v45, %v2892_v48  ;;  %v851_v9 = vsel %vm579_vm0, %v835_v2, 0.0  ;;  %v885_v11 = vmul.f32 %v2829_v44, %v2868_v16  ;;  %v897_v12 = vmul.f32 %v2831_v45, %v2868_v16 }
 0x229   : > { %843 = vadd.xlane.f32.xlu0 %v842_v63  ;;  %v903_v10 = vadd.f32 %v895_v4, %v883_v3  ;;  %v854_v13 = vsel %vm579_vm0, %v836_v5, 0.0  ;;  %v886_v15 = vmul.f32 %v2829_v44, %v2881_v37  ;;  %v898_v17 = vmul.f32 %v2831_v45, %v2881_v37 }
 0x22a   : > { %911 = vadd.xlane.f32.xlu1 %v910_v0  ;;  %v904_v14 = vadd.f32 %v896_v7, %v884_v43  ;;  %v905_v19 = vadd.f32 %v897_v12, %v885_v11  ;;  %v2559_v44 = vmov 0  }
 0x22b   : > { %v919_v18 = vsel %vm579_vm0, %v903_v10, 0.0  ;;  %v906_v25 = vadd.f32 %v898_v17, %v886_v15  ;;  %2285 = vset.pattern.permute.xlu1 %v2559_v44  ;;  %2287 = vset.pattern.permute.xlu0 %v2559_v44 }
 0x22c   : > { %v922_v20 = vsel %vm579_vm0, %v904_v14, 0.0  ;;  %v925_v26 = vsel %vm579_vm0, %v905_v19, 0.0 }
 0x22d   : > { %858 = vadd.xlane.f32.xlu0 %v857_v1  ;;  %v928_v27 = vsel %vm579_vm0, %v906_v25, 0.0 }
 0x22e   : > { %861 = vadd.xlane.f32.xlu1 %v860_v41 }
 0x231   : > { %852 = vadd.xlane.f32.xlu0 %v851_v9 }
 0x232   : > { %855 = vadd.xlane.f32.xlu1 %v854_v13 }
 0x235   : > { %920 = vadd.xlane.f32.xlu0 %v919_v18 }
 0x236   : > { %923 = vadd.xlane.f32.xlu1 %v922_v20 }
 0x239   : > { %926 = vadd.xlane.f32.xlu0 %v925_v26 }
 0x23a   : > { %929 = vadd.xlane.f32.xlu1 %v928_v27 }
 0x2a6   : > { %v847_v45 = vpop.xlane.xlu0 %846 }
 0x2a7   : > { %v869_v30 = vadd.f32 %v2810_v28, %v847_v45  ;;  %v909_v34 = vpop.xlane.xlu1 %908 }
 0x2a8   : > { %v931_v35 = vadd.f32 %v909_v34, %v2810_v28 }
 0x2a9   : > { %v941_v36 = vsub.f32 0.0, %v869_v30 }
 0x2aa   : > { %v987_v38 = vsub.f32 0.0, %v931_v35  ;;  %v915_v39 = vpop.xlane.xlu0 %914 }
 0x2ab   : > { %v951_v40 = vmul.f32 1.442695, %v941_v36  ;;  %v933_v32 = vadd.f32 %v915_v39, %v2810_v28  ;;  %v850_v47 = vpop.xlane.xlu1 %849 }
 0x2ac   : > { %v870_v49 = vadd.f32 %v2810_v28, %v850_v47  ;;  %v995_v51 = vmul.f32 1.442695, %v987_v38 }
 0x2ad   : > { %2317 = vpow2.f32 %v951_v40  ;;  %v989_v33 = vsub.f32 0.0, %v933_v32 }
 0x2ae   : > { %v942_v52 = vsub.f32 0.0, %v870_v49  ;;  %v841_v53 = vpop.xlane.xlu0 %840 }
 0x2af   : > { %v999_v54 = vmul.f32 1.442695, %v989_v33  ;;  %v867_v55 = vadd.f32 %v2810_v28, %v841_v53  ;;  %v918_v56 = vpop.xlane.xlu1 %917 }
 0x2b0   : > { %v934_v57 = vadd.f32 %v918_v56, %v2810_v28  ;;  %v953_v60 = vmul.f32 1.442695, %v942_v52 }
 0x2b1   : > { %2319 = vpow2.f32 %v999_v54  ;;  %v939_v59 = vsub.f32 0.0, %v867_v55 }
 0x2b2   : > { %2321 = vpow2.f32 %v995_v51  ;;  %v844_v61 = vpop.xlane.xlu0 %843  ;;  %v990_v0 = vsub.f32 0.0, %v934_v57 }
 0x2b3   : > { %v947_v62 = vmul.f32 1.442695, %v939_v59  ;;  %v912_v63 = vpop.xlane.xlu1 %911  ;;  %v868_v1 = vadd.f32 %v2810_v28, %v844_v61 }
 0x2b4   : > { %v1001_v4 = vmul.f32 1.442695, %v990_v0  ;;  %v932_v5 = vadd.f32 %v912_v63, %v2810_v28 }
 0x2b5   : > { %2323 = vpow2.f32 %v947_v62  ;;  %v940_v41 = vsub.f32 0.0, %v868_v1 }
 0x2b6   : > { %2325 = vpow2.f32 %v953_v60  ;;  %v859_v2 = vpop.xlane.xlu0 %858  ;;  %v988_v12 = vsub.f32 0.0, %v932_v5 }
 0x2b7   : > { %v862_v3 = vpop.xlane.xlu1 %861  ;;  %2327 = vpow2.f32 %v1001_v4  ;;  %v949_v11 = vmul.f32 1.442695, %v940_v41  ;;  %v873_v14 = vadd.f32 %v2810_v28, %v859_v2  ;;  %v2560_v4 = vmov 1  }
 0x2b8   : > { %v997_v26 = vmul.f32 1.442695, %v988_v12  ;;  %v874_v63 = vadd.f32 %v2810_v28, %v862_v3 }
 0x2b9   : > { %v945_v30 = vsub.f32 0.0, %v873_v14 }
 0x2ba   : > { %v2318_v43 = vpop.eup %2317  ;;  %v853_v7 = vpop.xlane.xlu0 %852 }
 0x2bb   : > { %v965_v9 = vadd.f32 1.0, %v2318_v43  ;;  %v856_v10 = vpop.xlane.xlu1 %855  ;;  %v871_v32 = vadd.f32 %v2810_v28, %v853_v7  ;;  %v959_v33 = vmul.f32 1.442695, %v945_v30  ;;  %v946_v7 = vsub.f32 0.0, %v874_v63 }
 0x2bc   : > { %v872_v13 = vadd.f32 %v2810_v28, %v856_v10 }
 0x2bd   : > { %2329 = vrcp.f32 %v965_v9  ;;  %v943_v54 = vsub.f32 0.0, %v871_v32 }
 0x2be   : > { %v2320_v15 = vpop.eup %2319  ;;  %v944_v17 = vsub.f32 0.0, %v872_v13  ;;  %v921_v18 = vpop.xlane.xlu0 %920  ;;  %2331 = vpow2.f32 %v949_v11  ;;  %v961_v13 = vmul.f32 1.442695, %v946_v7 }
 0x2bf   : > { %v2322_v19 = vpop.eup %2321  ;;  %v1013_v20 = vadd.f32 1.0, %v2320_v15  ;;  %v924_v25 = vpop.xlane.xlu1 %923  ;;  %v935_v53 = vadd.f32 %v921_v18, %v2810_v28  ;;  %v955_v60 = vmul.f32 1.442695, %v943_v54  ;;  %v2311_v54 = vld [vmem:[%s492_s2 + $0x8] sm:$0xff]  }
 0x2c0   : > { %v957_v27 = vmul.f32 1.442695, %v944_v17  ;;  %v936_v45 = vadd.f32 %v924_v25, %v2810_v28  ;;  %v1011_v35 = vadd.f32 1.0, %v2322_v19 }
 0x2c1   : > { %2333 = vrcp.f32 %v1013_v20  ;;  %v991_v59 = vsub.f32 0.0, %v935_v53 }
 0x2c2   : > { %v2324_v34 = vpop.eup %2323  ;;  %v992_v36 = vsub.f32 0.0, %v936_v45  ;;  %v927_v38 = vpop.xlane.xlu0 %926  ;;  %2335 = vpow2.f32 %v957_v27 }
 0x2c3   : > { %v2326_v39 = vpop.eup %2325  ;;  %v963_v40 = vadd.f32 1.0, %v2324_v34  ;;  %v937_v47 = vadd.f32 %v927_v38, %v2810_v28  ;;  %2337 = vpow2.f32 %v997_v26  ;;  %v1003_v1 = vmul.f32 1.442695, %v991_v59  ;;  %v930_v2 = vpop.xlane.xlu1 %929 }
 0x2c4   : > { %v1005_v49 = vmul.f32 1.442695, %v992_v36  ;;  %v966_v52 = vadd.f32 1.0, %v2326_v39  ;;  %v2328_v56 = vpop.eup %2327  ;;  %v938_v11 = vadd.f32 %v930_v2, %v2810_v28  ;;  %v2309_v39 = vld [vmem:[%s492_s2 + $0x18] sm:$0xff]  }
 0x2c5   : > { %2339 = vrcp.f32 %v963_v40  ;;  %v993_v51 = vsub.f32 0.0, %v937_v47  ;;  %v1014_v61 = vadd.f32 1.0, %v2328_v56  ;;  %2161 = vmatprep.subr.bf16.mxu0 %v2309_v39  ;;  %v2312_v56 = vld [vmem:[%s492_s2] sm:$0xff]  }
 0x2c6   : > { %2341 = vrcp.f32 %v1011_v35  ;;  %v994_v18 = vsub.f32 0.0, %v938_v11  ;;  %2162 = vmatpush3.bf16.msra.mxu0 %v2309_v39 }
 0x2c7   : > { %2343 = vpow2.f32 %v1005_v49  ;;  %v1007_v55 = vmul.f32 1.442695, %v993_v51  ;;  %v2310_v49 = vld [vmem:[%s492_s2 + $0x10] sm:$0xff]  }
 0x2c8   : > { %2345 = vpow2.f32 %v959_v33  ;;  %v1009_v28 = vmul.f32 1.442695, %v994_v18  ;;  %2163 = vmatprep.subr.bf16.mxu0 %v2310_v49 }
 0x2c9   : > { %2347 = vrcp.f32 %v966_v52 }
 0x2ca   : > { %v2330_v57 = vpop.eup %2329  ;;  %2349 = vpow2.f32 %v1007_v55  ;;  %2164 = vmatpush3.bf16.msra.mxu0 %v2310_v49 }
 0x2cb   : > { %1047 = vperm.xlu1 %2285, %v2330_v57   ;;  %v2332_v62 = vpop.eup %2331  ;;  %2351 = vpow2.f32 %v955_v60  ;;  %2165 = vmatprep.subr.bf16.mxu0 %v2311_v54 }
 0x2cc   : > { %2353 = vrcp.f32 %v1014_v61  ;;  %v964_v43 = vadd.f32 1.0, %v2332_v62 }
 0x2cd   : > { %2355 = vpow2.f32 %v1003_v1  ;;  %v2969_v1 = vand.u32 127, %v759_v24 }
 0x2ce   : > { %v2334_v0 = vpop.eup %2333  ;;  %2166 = vmatpush3.bf16.msra.mxu0 %v2311_v54 }
 0x2cf   : > { %2286 = vset.pattern.permute.xlu1 %v2560_v4  ;;  %v2336_v41 = vpop.eup %2335  ;;  %2167 = vmatprep.subr.bf16.mxu0 %v2312_v56  ;;  %vm794_vm1 = vcmp.lt.s32.totalorder %v2969_v1, 32  ;;  %vm1582_vm2 = vcmp.lt.s32.totalorder %v2969_v1, 16 }
 0x2d0   : > { %1095 = vperm.xlu1 %2286, %v2334_v0   ;;  %v2338_v5 = vpop.eup %2337  ;;  %v968_v9 = vadd.f32 1.0, %v2336_v41  ;;  %v2561_v41 = vmov 0.0  }
 0x2d1   : > { %v1012_v17 = vadd.f32 1.0, %v2338_v5  ;;  %v2973_v5 = vsel %vm794_vm1, 1.0, %v2561_v41 }
 0x2d2   : > { %v2340_v10 = vpop.eup %2339  ;;  %2357 = vrcp.f32 %v968_v9  ;;  %2168 = vmatpush3.bf16.msra.mxu0 %v2312_v56 }
 0x2d3   : > { %v2342_v12 = vpop.eup %2341  ;;  %1037 = vperm.xlu0 %2287, %v2340_v10   ;;  %2359 = vrcp.f32 %v964_v43 }
 0x2d4   : > { %v2344_v3 = vpop.eup %2343  ;;  %1085 = vperm.xlu1 %2286, %v2342_v12  }
 0x2d5   : > { %v1016_v14 = vadd.f32 1.0, %v2344_v3  ;;  %v2346_v15 = vpop.eup %2345 }
 0x2d6   : > { %v2348_v19 = vpop.eup %2347  ;;  %v969_v25 = vadd.f32 1.0, %v2346_v15 }
 0x2d7   : > { %2361 = vrcp.f32 %v1016_v14  ;;  %v2350_v20 = vpop.eup %2349 }
 0x2d8   : > { %2288 = vset.pattern.permute.xlu1 %v2559_v44  ;;  %2363 = vpow2.f32 %v961_v13  ;;  %v1017_v26 = vadd.f32 1.0, %v2350_v20  ;;  %v2352_v27 = vpop.eup %2351 }
 0x2d9   : > { %1052 = vperm.xlu1 %2288, %v2348_v19   ;;  %2365 = vrcp.f32 %v1012_v17  ;;  %v2354_v45 = vpop.eup %2353  ;;  %v967_v34 = vadd.f32 1.0, %v2352_v27 }
 0x2da   : > { %2367 = vrcp.f32 %v1017_v26  ;;  %v2356_v30 = vpop.eup %2355 }
 0x2db   : > { %2369 = vrcp.f32 %v969_v25  ;;  %v1015_v38 = vadd.f32 1.0, %v2356_v30 }
 0x2dc   : > { %2371 = vpow2.f32 %v1009_v28 }
 0x2dd   : > { %2289 = vset.pattern.permute.xlu1 %v2560_v4  ;;  %2373 = vrcp.f32 %v967_v34 }
 0x2de   : > { %1100 = vperm.xlu1 %2289, %v2354_v45   ;;  %2375 = vrcp.f32 %v1015_v38 }
 0x2df   : > { %v2358_v35 = vpop.eup %2357 }
 0x2e0   : > { %1062 = vperm.xlu0 %2287, %v2358_v35   ;;  %v2360_v36 = vpop.eup %2359 }
 0x2e2   : > { %2290 = vset.pattern.permute.xlu1 %v2559_v44 }
 0x2e3   : > { %1042 = vperm.xlu1 %2290, %v2360_v36  }
 0x2e4   : > { %v2362_v40 = vpop.eup %2361  ;;  %2295 = vset.pattern.permute.xlu0 %v2560_v4 }
 0x2e5   : > { %v2364_v32 = vpop.eup %2363  ;;  %1110 = vperm.xlu0 %2295, %v2362_v40  }
 0x2e6   : > { %v2366_v47 = vpop.eup %2365  ;;  %v970_v51 = vadd.f32 1.0, %v2364_v32 }
 0x2e7   : > { %2291 = vset.pattern.permute.xlu1 %v2560_v4  ;;  %v2368_v33 = vpop.eup %2367 }
 0x2e8   : > { %1090 = vperm.xlu1 %2291, %v2366_v47   ;;  %v2370_v52 = vpop.eup %2369  ;;  %2377 = vrcp.f32 %v970_v51 }
 0x2e9   : > { %1115 = vperm.xlu0 %2295, %v2368_v33   ;;  %v2372_v53 = vpop.eup %2371 }
 0x2ea   : > { %v1018_v55 = vadd.f32 1.0, %v2372_v53  ;;  %v2374_v57 = vpop.eup %2373 }
 0x2eb   : > { %v2376_v59 = vpop.eup %2375 }
 0x2ec   : > { %2292 = vset.pattern.permute.xlu1 %v2559_v44  ;;  %2379 = vrcp.f32 %v1018_v55 }
 0x2ed   : > { %1067 = vperm.xlu1 %2292, %v2370_v52  }
 0x2f1   : > { %1057 = vperm.xlu1 %2292, %v2374_v57  }
 0x2f5   : > { %2293 = vset.pattern.permute.xlu1 %v2560_v4  ;;  %v2378_v60 = vpop.eup %2377 }
 0x2f6   : > { %1105 = vperm.xlu1 %2293, %v2376_v59  }
 0x2f9   : > { %v2380_v61 = vpop.eup %2379 }
 0x2fa   : > { %2294 = vset.pattern.permute.xlu1 %v2559_v44  ;;  %v2976_v44 = vsub.f32 1.0, %v2973_v5 }
 0x2fb   : > { %1072 = vperm.xlu1 %2294, %v2378_v60  }
 0x2ff   : > { %2296 = vset.pattern.permute.xlu1 %v2560_v4 }
 0x300   : > { %1120 = vperm.xlu1 %2296, %v2380_v61  }
 0x346   : > { %v1048_v62 = vpop.permute.xlu1 %1047 }
 0x347   : > { %v1077_v3 = vmul.f32 %v2973_v5, %v1048_v62 }
 0x34b   : > { %v1096_v63 = vpop.permute.xlu1 %1095 }
 0x34c   : > { %v1125_v24 = vmul.f32 %v1096_v63, %v2976_v44 }
 0x34e   : > { %v1038_v43 = vpop.permute.xlu0 %1037  ;;  %v2988_v15 = vadd.f32 %v1125_v24, %v1077_v3 }
 0x34f   : > { %v1086_v0 = vpop.permute.xlu1 %1085  ;;  %v1075_v9 = vmul.f32 %v2973_v5, %v1038_v43 }
 0x350   : > { %v1123_v10 = vmul.f32 %v1086_v0, %v2976_v44  ;;  %v1149_v28 = vsub.f32 1.0, %v2988_v15  ;;  %v1141_v51 = vmul.f32 %v2988_v15, %v2833_v46 }
 0x352   : > { %v2986_v14 = vadd.f32 %v1123_v10, %v1075_v9  ;;  %v3005_v38 = vmul.f32 %v1149_v28, %v2833_v46 }
 0x354   : > { %v1053_v2 = vpop.permute.xlu1 %1052  ;;  %v1147_v20 = vsub.f32 1.0, %v2986_v14  ;;  %v1139_v39 = vmul.f32 %v2986_v14, %v2836_v50  ;;  %v1165_v54 = vadd.f32 %v3005_v38, %v1141_v51 }
 0x355   : > { %v1078_v11 = vmul.f32 %v2973_v5, %v1053_v2 }
 0x356   : > { %v3001_v34 = vmul.f32 %v1147_v20, %v2836_v50 }
 0x358   : > { %v1163_v50 = vadd.f32 %v3001_v34, %v1139_v39 }
 0x359   : > { %v1101_v7 = vpop.permute.xlu1 %1100 }
 0x35a   : > { %v1126_v4 = vmul.f32 %v1101_v7, %v2976_v44 }
 0x35b   : > { %v1063_v17 = vpop.permute.xlu0 %1062 }
 0x35c   : > { %v2984_v13 = vadd.f32 %v1126_v4, %v1078_v11  ;;  %v1080_v32 = vmul.f32 %v2973_v5, %v1063_v17 }
 0x35e   : > { %v1043_v12 = vpop.permute.xlu1 %1042  ;;  %v1150_v18 = vsub.f32 1.0, %v2984_v13  ;;  %v1142_v40 = vmul.f32 %v2984_v13, %v2847_v58 }
 0x35f   : > { %v1076_v25 = vmul.f32 %v2973_v5, %v1043_v12 }
 0x360   : > { %v2998_v45 = vmul.f32 %v1150_v18, %v2847_v58  ;;  %v1111_v30 = vpop.permute.xlu0 %1110 }
 0x361   : > { %v1128_v47 = vmul.f32 %v1111_v30, %v2976_v44 }
 0x362   : > { %v1166_v52 = vadd.f32 %v2998_v45, %v1142_v40 }
 0x363   : > { %v1091_v19 = vpop.permute.xlu1 %1090  ;;  %v3024_v55 = vadd.f32 %v1128_v47, %v1080_v32 }
 0x364   : > { %v1124_v26 = vmul.f32 %v1091_v19, %v2976_v44  ;;  %v1172_v57 = vpack.c.bf16 %v1166_v52, %v1165_v54  ;;  %v2314_v54 = vld [vmem:[%s501_s30 + $0x10] sm:$0xff]  }
 0x365   : > { %v1152_v46 = vsub.f32 1.0, %v3024_v55  ;;  %v1144_v4 = vmul.f32 %v3024_v55, %v2892_v48 }
 0x366   : > { %v2995_v27 = vadd.f32 %v1124_v26, %v1076_v25 }
 0x367   : > { %v3036_v2 = vmul.f32 %v1152_v46, %v2892_v48 }
 0x368   : > { %v1148_v35 = vsub.f32 1.0, %v2995_v27  ;;  %v1068_v36 = vpop.permute.xlu1 %1067  ;;  %v1140_v49 = vmul.f32 %v2995_v27, %v2858_v6 }
 0x369   : > { %v1081_v63 = vmul.f32 %v2973_v5, %v1068_v36  ;;  %v1168_v11 = vadd.f32 %v3036_v2, %v1144_v4 }
 0x36a   : > { %v3016_v33 = vmul.f32 %v1148_v35, %v2858_v6  ;;  %v1116_v6 = vpop.permute.xlu0 %1115 }
 0x36b   : > { %v1129_v62 = vmul.f32 %v1116_v6, %v2976_v44 }
 0x36c   : > { %v1164_v53 = vadd.f32 %v3016_v33, %v1140_v49  ;;  %v1058_v58 = vpop.permute.xlu1 %1057 }
 0x36d   : > { %v1079_v60 = vmul.f32 %v2973_v5, %v1058_v58  ;;  %v3041_v9 = vadd.f32 %v1129_v62, %v1081_v63  ;;  %v2313_v58 = vld [vmem:[%s501_s30 + $0x18] sm:$0xff]  }
 0x36e   : > { %v1171_v56 = vpack.c.bf16 %v1164_v53, %v1163_v50  ;;  %2193 = vmatprep.subr.bf16.mxu0 %v2313_v58 }
 0x36f   : > { %v1153_v17 = vsub.f32 1.0, %v3041_v9  ;;  %v1145_v26 = vmul.f32 %v3041_v9, %v2868_v16 }
 0x370   : > { %2169 = vmatprep.mubr.msk.bf16.mxu0 %vm579_vm0, %v1171_v56 }
 0x371   : > { %2170 = vmatmul.mubr.msk.bf16.vlgmr.msra.gmra.mxu0 %vm579_vm0, %v1172_v57  ;;  %v1106_v59 = vpop.permute.xlu1 %1105  ;;  %v3057_v25 = vmul.f32 %v1153_v17, %v2868_v16 }
 0x372   : > { %v1127_v61 = vmul.f32 %v1106_v59, %v2976_v44  ;;  %2194 = vmatpush3.bf16.msra.mxu0 %v2313_v58 }
 0x373   : > { %2195 = vmatprep.subr.bf16.mxu0 %v2314_v54 }
 0x374   : > { %v3033_v0 = vadd.f32 %v1127_v61, %v1079_v60 }
 0x376   : > { %v1151_v43 = vsub.f32 1.0, %v3033_v0  ;;  %v1073_v7 = vpop.permute.xlu1 %1072  ;;  %v1143_v10 = vmul.f32 %v3033_v0, %v2886_v42  ;;  %2196 = vmatpush3.bf16.msra.mxu0 %v2314_v54 }
 0x377   : > { %v1082_v18 = vmul.f32 %v2973_v5, %v1073_v7 }
 0x378   : > { %v3046_v24 = vmul.f32 %v1151_v43, %v2886_v42 }
 0x37a   : > { %v1167_v12 = vadd.f32 %v3046_v24, %v1143_v10 }
 0x37b   : > { %v1121_v3 = vpop.permute.xlu1 %1120 }
 0x37c   : > { %v1130_v19 = vmul.f32 %v1121_v3, %v2976_v44  ;;  %v1173_v48 = vpack.c.bf16 %v1168_v11, %v1167_v12  ;;  %v1169_v44 = vadd.f32 %v3057_v25, %v1145_v26 }
 0x37e   : > { %v3053_v20 = vadd.f32 %v1130_v19, %v1082_v18  ;;  %2173 = vmatprep.mubr.msk.bf16.mxu0 %vm579_vm0, %v1173_v48 }
 0x380   : > { %v1154_v42 = vsub.f32 1.0, %v3053_v20  ;;  %v1146_v28 = vmul.f32 %v3053_v20, %v2881_v37 }
 0x382   : > { %v3065_v5 = vmul.f32 %v1154_v42, %v2881_v37 }
 0x384   : > { %v1170_v30 = vadd.f32 %v3065_v5, %v1146_v28 }
 0x386   : > { %v1174_v35 = vpack.c.bf16 %v1170_v30, %v1169_v44 }
 0x388   : > { %2174 = vmatmul.mubr.msk.bf16.gmra.mxu0 %vm579_vm0, %v1174_v35 }
 0x431   : > { %v2171_v36 = vpop.f32.mrf.mxu0 }
 0x433   : > { %v1245_v39 = vpop.f32.mrf.mxu0 }
 0x435   : > { %v2172_v40 = vpop.f32.mrf.mxu0 }
 0x436   : > { %v1277_v37 = vpack.c.bf16 %v2172_v40, %v2171_v36 }
 0x437   : > { %v1248_v32 = vpop.f32.mrf.mxu0 }
 0x438   : > { %v1276_v53 = vpack.c.bf16 %v1248_v32, %v1245_v39 }
 0x448   : > { %v2175_v47 = vpop.f32.mrf.mxu0 }
 0x44a   : > { %v1261_v49 = vpop.f32.mrf.mxu0 }
 0x44c   : > { %v2176_v16 = vpop.f32.mrf.mxu0 }
 0x44d   : > { %v1279_v51 = vpack.c.bf16 %v2176_v16, %v2175_v47 }
 0x44e   : > { %v1264_v52 = vpop.f32.mrf.mxu0 }
 0x44f   : > { %v1278_v50 = vpack.c.bf16 %v1264_v52, %v1261_v49  ;;  %2177 = vmatprep.subr.bf16.mxu1 %v1279_v51 }
 0x450   : > { %2178 = vmatpush3.bf16.msra.mxu1 %v1279_v51 }
 0x451   : > { %2179 = vmatprep.subr.bf16.mxu1 %v1278_v50 }
 0x454   : > { %2180 = vmatpush3.bf16.msra.mxu1 %v1278_v50 }
 0x455   : > { %2181 = vmatprep.subr.bf16.mxu1 %v1277_v37 }
 0x458   : > { %2182 = vmatpush3.bf16.msra.mxu1 %v1277_v37 }
 0x459   : > { %2183 = vmatprep.subr.bf16.mxu1 %v1276_v53 }
 0x45c   : > { %2184 = vmatpush3.bf16.msra.mxu1 %v1276_v53 }
 0x45f   : > { %2186 = vmatmul.mubr.msk.bf16.vlgmr.msra.gmra.mxu1 %vm579_vm0, %v2789_v21  ;;  %v2315_v21 = vld [vmem:[%s501_s30 + $0x8] sm:$0xff]  }
 0x460   : > { %2189 = vmatprep.mubr.msk.bf16.mxu1 %vm579_vm0, %v2792_v22  ;;  %2197 = vmatprep.subr.bf16.mxu0 %v2315_v21  ;;  %v2316_v22 = vld [vmem:[%s501_s30] sm:$0xff]  }
 0x461   : > { %2198 = vmatpush3.bf16.msra.mxu0 %v2315_v21 }
 0x462   : > { %2199 = vmatprep.subr.bf16.mxu0 %v2316_v22 }
 0x465   : > { %2200 = vmatpush3.bf16.msra.mxu0 %v2316_v22 }
 0x467   : > { %2190 = vmatmul.mubr.msk.bf16.gmra.mxu1 %vm579_vm0, %v2799_v23 }
 0x468   : > { %2217 = vmatprep.mubr.msk.bf16.mxu1 %vm579_vm0, %v2784_v8  ;;  %v806_v8 = vld [vmem:[%s496_s21] sm:$0x3] }
 0x469   : > { %v1348_v23 = vrot.slane %v806_v8, %v2814_v29  ;;  %v1360_v57 = vrot.slane %v806_v8, %v2816_v31 }
 0x51f   : > { %v2187_v56 = vpop.f32.mrf.mxu1 }
 0x520   : > { %v1351_v6 = vmul.f32 %v2187_v56, %v1348_v23 }
 0x521   : > { %v1314_v59 = vpop.f32.mrf.mxu1 }
 0x522   : > { %v1349_v46 = vmul.f32 %v1348_v23, %v1314_v59  ;;  %v1363_v60 = vadd.f32 %v1360_v57, %v1351_v6  ;;  %v2429_v59 = vld [vmem:[%s2781_s19 + $0x8] sm:$0xff]  }
 0x523   : > { %v2188_v61 = vpop.f32.mrf.mxu1 }
 0x524   : > { %v1361_v62 = vadd.f32 %v1360_v57, %v1349_v46  ;;  %v1352_v63 = vmul.f32 %v2188_v61, %v1348_v23  ;;  %v1371_v11 = vmax.f32 %v1363_v60, 0.0  ;;  %v2430_v46 = vld [vmem:[%s2781_s19 + $0x10] sm:$0xff]   ;;  %v2431_v60 = vld [vmem:[%s2781_s19 + $0x18] sm:$0xff]   ;;  %v2068_v61 = vld [vmem:[%s504_s22] ss:$0 sm:$0xff]  ;;  %s2080_s19 = sshll.u32 %s3378_s14, 6 }
 0x525   : > { %v1317_v43 = vpop.f32.mrf.mxu1  ;;  %s3293_s12 = scalar_lea.vmem %s3355_s9, %s2080_s19 }
 0x526   : > { %v1369_v7 = vmax.f32 %v1361_v62, 0.0  ;;  %v1364_v4 = vadd.f32 %v1360_v57, %v1352_v63  ;;  %v1350_v10 = vmul.f32 %v1348_v23, %v1317_v43  ;;  %v1379_v26 = vmul.f32 %v1371_v11, %v2988_v15 }
 0x527   : > { %v2191_v12 = vpop.f32.mrf.mxu1 }
 0x528   : > { %v1372_v3 = vmax.f32 %v1364_v4, 0.0  ;;  %v1362_v17 = vadd.f32 %v1360_v57, %v1350_v10  ;;  %v1355_v18 = vmul.f32 %v2191_v12, %v1348_v23  ;;  %v1377_v19 = vmul.f32 %v1369_v7, %v2986_v14 }
 0x529   : > { %v1330_v29 = vpop.f32.mrf.mxu1 }
 0x52a   : > { %v1380_v31 = vmul.f32 %v1372_v3, %v2984_v13  ;;  %v1370_v48 = vmax.f32 %v1362_v17, 0.0  ;;  %v1353_v42 = vmul.f32 %v1348_v23, %v1330_v29  ;;  %v1367_v30 = vadd.f32 %v1360_v57, %v1355_v18 }
 0x52b   : > { %v2192_v28 = vpop.f32.mrf.mxu1  ;;  %v1385_v32 = vadd.f32 %v1377_v19, %v3001_v34  ;;  %v1387_v13 = vadd.f32 %v1379_v26, %v3005_v38 }
 0x52c   : > { %v1378_v44 = vmul.f32 %v1370_v48, %v2995_v27  ;;  %v1365_v35 = vadd.f32 %v1360_v57, %v1353_v42  ;;  %v1356_v36 = vmul.f32 %v2192_v28, %v1348_v23  ;;  %v1388_v39 = vadd.f32 %v1380_v31, %v2998_v45 }
 0x52d   : > { %v1333_v40 = vpop.f32.mrf.mxu1  ;;  %v1375_v51 = vmax.f32 %v1367_v30, 0.0 }
 0x52e   : > { %v1386_v47 = vadd.f32 %v1378_v44, %v3016_v33  ;;  %v1368_v14 = vadd.f32 %v1360_v57, %v1356_v36  ;;  %v1373_v49 = vmax.f32 %v1365_v35, 0.0  ;;  %v1354_v16 = vmul.f32 %v1348_v23, %v1333_v40 }
 0x52f   : > { %v1394_v50 = vpack.c.bf16 %v1388_v39, %v1387_v13  ;;  %v1383_v34 = vmul.f32 %v1375_v51, %v3041_v9 }
 0x530   : > { %v1376_v15 = vmax.f32 %v1368_v14, 0.0  ;;  %v1393_v52 = vpack.c.bf16 %v1386_v47, %v1385_v32  ;;  %v1366_v27 = vadd.f32 %v1360_v57, %v1354_v16  ;;  %v1381_v45 = vmul.f32 %v1373_v49, %v3033_v0 }
 0x531   : > { %v1391_v21 = vadd.f32 %v1383_v34, %v3057_v25 }
 0x532   : > { %v1384_v37 = vmul.f32 %v1376_v15, %v3053_v20  ;;  %2201 = vmatprep.mubr.msk.bf16.mxu0 %vm579_vm0, %v1393_v52  ;;  %v1374_v53 = vmax.f32 %v1366_v27, 0.0  ;;  %v1389_v58 = vadd.f32 %v1381_v45, %v3046_v24 }
 0x533   : > { %2202 = vmatmul.mubr.msk.bf16.vlgmr.msra.gmra.mxu0 %vm579_vm0, %v1394_v50 }
 0x534   : > { %v1382_v38 = vmul.f32 %v1374_v53, %v3024_v55  ;;  %v1392_v33 = vadd.f32 %v1384_v37, %v3065_v5 }
 0x536   : > { %v1390_v54 = vadd.f32 %v1382_v38, %v3036_v2  ;;  %v1396_v22 = vpack.c.bf16 %v1392_v33, %v1391_v21 }
 0x538   : > { %v1395_v20 = vpack.c.bf16 %v1390_v54, %v1389_v58 }
 0x53a   : > { %2205 = vmatprep.mubr.msk.bf16.mxu0 %vm579_vm0, %v1395_v20 }
 0x53b   : > { %2206 = vmatmul.mubr.msk.bf16.gmra.mxu0 %vm579_vm0, %v1396_v22 }
 0x5f3   : > { %v2203_v0 = vpop.f32.mrf.mxu0 }
 0x5f5   : > { %v1475_v8 = vpop.f32.mrf.mxu0 }
 0x5f7   : > { %v2204_v23 = vpop.f32.mrf.mxu0 }
 0x5f8   : > { %v1507_v25 = vpack.c.bf16 %v2204_v23, %v2203_v0  ;;  %v3202_v23 = vsel %vm1582_vm2, 1.0, %v2561_v41 }
 0x5f9   : > { %v1478_v9 = vpop.f32.mrf.mxu0 }
 0x5fa   : > { %v1506_v6 = vpack.c.bf16 %v1478_v9, %v1475_v8  ;;  %v3205_v9 = vsub.f32 1.0, %v3202_v23 }
 0x5fb   : > { %v2207_v56 = vpop.f32.mrf.mxu0 }
 0x5fd   : > { %v1491_v55 = vpop.f32.mrf.mxu0 }
 0x5ff   : > { %v2208_v5 = vpop.f32.mrf.mxu0 }
 0x600   : > { %v1509_v24 = vpack.c.bf16 %v2208_v5, %v2207_v56 }
 0x601   : > { %v1494_v57 = vpop.f32.mrf.mxu0 }
 0x602   : > { %v1508_v2 = vpack.c.bf16 %v1494_v57, %v1491_v55  ;;  %2209 = vmatprep.subr.bf16.mxu1 %v1509_v24 }
 0x603   : > { %2210 = vmatpush3.bf16.msra.mxu1 %v1509_v24 }
 0x604   : > { %2211 = vmatprep.subr.bf16.mxu1 %v1508_v2 }
 0x607   : > { %2212 = vmatpush3.bf16.msra.mxu1 %v1508_v2 }
 0x608   : > { %2213 = vmatprep.subr.bf16.mxu1 %v1507_v25 }
 0x60b   : > { %2214 = vmatpush3.bf16.msra.mxu1 %v1507_v25 }
 0x60c   : > { %2215 = vmatprep.subr.bf16.mxu1 %v1506_v6 }
 0x60f   : > { %2216 = vmatpush3.bf16.msra.mxu1 %v1506_v6 }
 0x612   : > { %2218 = vmatmul.mubr.msk.bf16.vlgmr.msra.gmra.mxu1 %vm579_vm0, %v2429_v59 }
 0x613   : > { %2221 = vmatprep.mubr.msk.bf16.mxu1 %vm579_vm0, %v2430_v46 }
 0x61a   : > { %2222 = vmatmul.mubr.msk.bf16.gmra.mxu1 %vm579_vm0, %v2431_v60 }
 0x6d2   : > { %v2219_v62 = vpop.f32.mrf.mxu1 }
 0x6d3   : > { %v3119_v63 = vadd.f32 %v2219_v62, %v2068_v61 }
 0x6d4   : > { %v1551_v43 = vpop.f32.mrf.mxu1 }
 0x6d5   : > { %v3121_v7 = vadd.f32 %v2068_v61, %v1551_v43  ;;  %v1622_v4 = vsel %vm1582_vm2, -1e+30, %v3119_v63  ;;  %v1589_v10 = vsel %vm1582_vm2, %v3119_v63, -1e+30 }
 0x6d6   : > { %v2220_v11 = vpop.f32.mrf.mxu1  ;;  %v1634_v12 = vsel %vm1595_vm3, %v1622_v4, -inf  ;;  %v1602_v3 = vsel %vm1595_vm3, %v1589_v10, -inf }
 0x6d7   : > { %v3131_v17 = vadd.f32 %v2220_v11, %v2068_v61  ;;  %1635 = vmax.xlane.f32.xlu1 %v1634_v12  ;;  %1603 = vmax.xlane.f32.xlu0 %v1602_v3  ;;  %v1620_v18 = vsel %vm1582_vm2, -1e+30, %v3121_v7  ;;  %v1587_v29 = vsel %vm1582_vm2, %v3121_v7, -1e+30 }
 0x6d8   : > { %v1554_v19 = vpop.f32.mrf.mxu1  ;;  %v1628_v48 = vsel %vm1595_vm3, %v1620_v18, -inf  ;;  %v1596_v42 = vsel %vm1595_vm3, %v1587_v29, -inf }
 0x6d9   : > { %v3139_v31 = vadd.f32 %v2068_v61, %v1554_v19  ;;  %v1590_v30 = vsel %vm1582_vm2, %v3131_v17, -1e+30  ;;  %v1623_v47 = vsel %vm1582_vm2, -1e+30, %v3131_v17 }
 0x6da   : > { %v2223_v26 = vpop.f32.mrf.mxu1  ;;  %v1605_v32 = vsel %vm1595_vm3, %v1590_v30, -inf  ;;  %v1637_v16 = vsel %vm1595_vm3, %v1623_v47, -inf }
 0x6db   : > { %1629 = vmax.xlane.f32.xlu1 %v1628_v48  ;;  %1597 = vmax.xlane.f32.xlu0 %v1596_v42  ;;  %v3143_v28 = vadd.f32 %v2223_v26, %v2068_v61  ;;  %v1588_v44 = vsel %vm1582_vm2, %v3139_v31, -1e+30  ;;  %v1621_v15 = vsel %vm1582_vm2, -1e+30, %v3139_v31 }
 0x6dc   : > { %v1567_v35 = vpop.f32.mrf.mxu1  ;;  %v1599_v40 = vsel %vm1595_vm3, %v1588_v44, -inf  ;;  %v1631_v27 = vsel %vm1595_vm3, %v1621_v15, -inf }
 0x6dd   : > { %v3151_v36 = vadd.f32 %v2068_v61, %v1567_v35  ;;  %v1593_v39 = vsel %vm1582_vm2, %v3143_v28, -1e+30  ;;  %v1626_v33 = vsel %vm1582_vm2, -1e+30, %v3143_v28 }
 0x6de   : > { %v2224_v14 = vpop.f32.mrf.mxu1  ;;  %v1614_v13 = vsel %vm1595_vm3, %v1593_v39, -inf  ;;  %v1646_v54 = vsel %vm1595_vm3, %v1626_v33, -inf }
 0x6df   : > { %1600 = vmax.xlane.f32.xlu1 %v1599_v40  ;;  %1606 = vmax.xlane.f32.xlu0 %v1605_v32  ;;  %v1591_v49 = vsel %vm1582_vm2, %v3151_v36, -1e+30  ;;  %v3166_v51 = vadd.f32 %v2224_v14, %v2068_v61  ;;  %v1624_v45 = vsel %vm1582_vm2, -1e+30, %v3151_v36 }
 0x6e0   : > { %v1570_v52 = vpop.f32.mrf.mxu1  ;;  %v1608_v50 = vsel %vm1595_vm3, %v1591_v49, -inf  ;;  %v1640_v34 = vsel %vm1595_vm3, %v1624_v45, -inf }
 0x6e1   : > { %v3173_v37 = vadd.f32 %v2068_v61, %v1570_v52  ;;  %v1594_v53 = vsel %vm1582_vm2, %v3166_v51, -1e+30  ;;  %v1627_v0 = vsel %vm1582_vm2, -1e+30, %v3166_v51 }
 0x6e2   : > { %v1617_v38 = vsel %vm1595_vm3, %v1594_v53, -inf  ;;  %v1649_v8 = vsel %vm1595_vm3, %v1627_v0, -inf }
 0x6e3   : > { %1615 = vmax.xlane.f32.xlu1 %v1614_v13  ;;  %1638 = vmax.xlane.f32.xlu0 %v1637_v16  ;;  %v1592_v58 = vsel %vm1582_vm2, %v3173_v37, -1e+30  ;;  %v1625_v20 = vsel %vm1582_vm2, -1e+30, %v3173_v37 }
 0x6e4   : > { %v1611_v21 = vsel %vm1595_vm3, %v1592_v58, -inf  ;;  %v1643_v22 = vsel %vm1595_vm3, %v1625_v20, -inf }
 0x6e7   : > { %1609 = vmax.xlane.f32.xlu1 %v1608_v50  ;;  %1632 = vmax.xlane.f32.xlu0 %v1631_v27 }
 0x6eb   : > { %1641 = vmax.xlane.f32.xlu1 %v1640_v34  ;;  %1618 = vmax.xlane.f32.xlu0 %v1617_v38 }
 0x6ef   : > { %1647 = vmax.xlane.f32.xlu1 %v1646_v54  ;;  %1612 = vmax.xlane.f32.xlu0 %v1611_v21 }
 0x6f3   : > { %1644 = vmax.xlane.f32.xlu0 %v1643_v22 }
 0x6f7   : > { %1650 = vmax.xlane.f32.xlu0 %v1649_v8 }
 0x760   : > { %v1636_v56 = vpop.xlane.xlu1 %1635  ;;  %v1604_v55 = vpop.xlane.xlu0 %1603 }
 0x761   : > { %v1662_v5 = vmul.f32 %v1636_v56, %v3205_v9  ;;  %v1654_v24 = vmul.f32 %v3202_v23, %v1604_v55 }
 0x763   : > { %v1670_v57 = vadd.f32 %v1662_v5, %v1654_v24 }
 0x764   : > { %v1630_v2 = vpop.xlane.xlu1 %1629  ;;  %v1598_v25 = vpop.xlane.xlu0 %1597 }
 0x765   : > { %v3210_v6 = vsub.f32 %v3119_v63, %v1670_v57  ;;  %v1660_v59 = vmul.f32 %v1630_v2, %v3205_v9  ;;  %v1652_v1 = vmul.f32 %v3202_v23, %v1598_v25 }
 0x767   : > { %v1688_v41 = vmul.f32 1.442695, %v3210_v6  ;;  %v1668_v46 = vadd.f32 %v1660_v59, %v1652_v1 }
 0x768   : > { %v1601_v60 = vpop.xlane.xlu1 %1600  ;;  %v1607_v61 = vpop.xlane.xlu0 %1606 }
 0x769   : > { %2381 = vpow2.f32 %v1688_v41  ;;  %v3216_v62 = vsub.f32 %v3121_v7, %v1668_v46  ;;  %v1655_v63 = vmul.f32 %v3202_v23, %v1607_v61  ;;  %v1653_v29 = vmul.f32 %v3202_v23, %v1601_v60 }
 0x76b   : > { %v1684_v43 = vmul.f32 1.442695, %v3216_v62 }
 0x76c   : > { %v1616_v4 = vpop.xlane.xlu1 %1615  ;;  %v1639_v10 = vpop.xlane.xlu0 %1638 }
 0x76d   : > { %v1663_v11 = vmul.f32 %v1639_v10, %v3205_v9  ;;  %2383 = vpow2.f32 %v1684_v43  ;;  %v1658_v49 = vmul.f32 %v3202_v23, %v1616_v4 }
 0x76f   : > { %v1671_v12 = vadd.f32 %v1663_v11, %v1655_v63 }
 0x770   : > { %v1610_v3 = vpop.xlane.xlu1 %1609  ;;  %v1633_v18 = vpop.xlane.xlu0 %1632 }
 0x771   : > { %v3223_v19 = vsub.f32 %v3131_v17, %v1671_v12  ;;  %v1661_v7 = vmul.f32 %v1633_v18, %v3205_v9  ;;  %v1656_v30 = vmul.f32 %v3202_v23, %v1610_v3 }
 0x773   : > { %v1690_v48 = vmul.f32 1.442695, %v3223_v19  ;;  %v1669_v42 = vadd.f32 %v1661_v7, %v1653_v29 }
 0x774   : > { %v1642_v26 = vpop.xlane.xlu1 %1641  ;;  %v1619_v44 = vpop.xlane.xlu0 %1618 }
 0x775   : > { %2385 = vpow2.f32 %v1690_v48  ;;  %v3229_v35 = vsub.f32 %v3139_v31, %v1669_v42  ;;  %v1664_v39 = vmul.f32 %v1642_v26, %v3205_v9  ;;  %v1659_v22 = vmul.f32 %v3202_v23, %v1619_v44 }
 0x776   : > { %v2382_v40 = vpop.eup %2381 }
 0x777   : > { %v1686_v32 = vmul.f32 1.442695, %v3229_v35  ;;  %v1672_v17 = vadd.f32 %v1664_v39, %v1656_v30  ;;  %v1702_v47 = vmul.f32 %v2382_v40, %v3202_v23  ;;  %v1734_v52 = vmul.f32 %v2382_v40, %v3205_v9 }
 0x778   : > { %v1648_v14 = vpop.xlane.xlu1 %1647  ;;  %v1613_v13 = vpop.xlane.xlu0 %1612 }
 0x779   : > { %2387 = vpow2.f32 %v1686_v32  ;;  %v3236_v16 = vsub.f32 %v3151_v36, %v1672_v17  ;;  %v1666_v15 = vmul.f32 %v1648_v14, %v3205_v9  ;;  %v1714_v31 = vsel %vm1595_vm3, %v1702_v47, 0.0 }
 0x77a   : > { %v2384_v50 = vpop.eup %2383  ;;  %1715 = vadd.xlane.f32.xlu1 %v1714_v31  ;;  %v1657_v38 = vmul.f32 %v3202_v23, %v1613_v13  ;;  %v1746_v33 = vsel %vm1595_vm3, %v1734_v52, 0.0 }
 0x77b   : > { %v1674_v27 = vadd.f32 %v1666_v15, %v1658_v49  ;;  %v1692_v45 = vmul.f32 1.442695, %v3236_v16  ;;  %v1700_v58 = vmul.f32 %v2384_v50, %v3202_v23  ;;  %v1732_v55 = vmul.f32 %v2384_v50, %v3205_v9 }
 0x77c   : > { %v1645_v53 = vpop.xlane.xlu0 %1644 }
 0x77d   : > { %v3243_v34 = vsub.f32 %v3143_v28, %v1674_v27  ;;  %v1665_v36 = vmul.f32 %v1645_v53, %v3205_v9  ;;  %2389 = vpow2.f32 %v1692_v45  ;;  %v1708_v56 = vsel %vm1595_vm3, %v1700_v58, 0.0 }
 0x77e   : > { %1747 = vadd.xlane.f32.xlu1 %v1746_v33  ;;  %v1740_v1 = vsel %vm1595_vm3, %v1732_v55, 0.0 }
 0x77f   : > { %v1696_v54 = vmul.f32 1.442695, %v3243_v34  ;;  %v1673_v21 = vadd.f32 %v1665_v36, %v1657_v38 }
 0x780   : > { %v1651_v20 = vpop.xlane.xlu0 %1650 }
 0x781   : > { %2391 = vpow2.f32 %v1696_v54  ;;  %v3252_v28 = vsub.f32 %v3173_v37, %v1673_v21  ;;  %v1667_v0 = vmul.f32 %v1651_v20, %v3205_v9 }
 0x782   : > { %v2386_v8 = vpop.eup %2385  ;;  %1709 = vadd.xlane.f32.xlu1 %v1708_v56 }
 0x783   : > { %v1675_v5 = vadd.f32 %v1667_v0, %v1659_v22  ;;  %v1703_v24 = vmul.f32 %v2386_v8, %v3202_v23  ;;  %v1694_v57 = vmul.f32 1.442695, %v3252_v28  ;;  %v1735_v37 = vmul.f32 %v2386_v8, %v3205_v9 }
 0x785   : > { %v3260_v2 = vsub.f32 %v3166_v51, %v1675_v5  ;;  %v1717_v25 = vsel %vm1595_vm3, %v1703_v24, 0.0  ;;  %2393 = vpow2.f32 %v1694_v57  ;;  %v1749_v46 = vsel %vm1595_vm3, %v1735_v37, 0.0 }
 0x786   : > { %v2388_v59 = vpop.eup %2387  ;;  %1718 = vadd.xlane.f32.xlu0 %v1717_v25  ;;  %1741 = vadd.xlane.f32.xlu1 %v1740_v1 }
 0x787   : > { %v1698_v41 = vmul.f32 1.442695, %v3260_v2  ;;  %v1701_v60 = vmul.f32 %v2388_v59, %v3202_v23  ;;  %v1733_v43 = vmul.f32 %v2388_v59, %v3205_v9 }
 0x789   : > { %2395 = vpow2.f32 %v1698_v41  ;;  %v1711_v61 = vsel %vm1595_vm3, %v1701_v60, 0.0  ;;  %v1743_v11 = vsel %vm1595_vm3, %v1733_v43, 0.0 }
 0x78a   : > { %1750 = vadd.xlane.f32.xlu0 %v1749_v46  ;;  %v2390_v51 = vpop.eup %2389 }
 0x78b   : > { %v1704_v12 = vmul.f32 %v2390_v51, %v3202_v23  ;;  %v1736_v29 = vmul.f32 %v2390_v51, %v3205_v9 }
 0x78d   : > { %v1720_v18 = vsel %vm1595_vm3, %v1704_v12, 0.0  ;;  %v1752_v42 = vsel %vm1595_vm3, %v1736_v29, 0.0 }
 0x78e   : > { %v2392_v4 = vpop.eup %2391  ;;  %1712 = vadd.xlane.f32.xlu0 %v1711_v61 }
 0x78f   : > { %v1706_v10 = vmul.f32 %v2392_v4, %v3202_v23  ;;  %v1738_v44 = vmul.f32 %v2392_v4, %v3205_v9 }
 0x791   : > { %v1726_v63 = vsel %vm1595_vm3, %v1706_v10, 0.0  ;;  %v1758_v39 = vsel %vm1595_vm3, %v1738_v44, 0.0 }
 0x792   : > { %1727 = vadd.xlane.f32.xlu1 %v1726_v63  ;;  %1744 = vadd.xlane.f32.xlu0 %v1743_v11  ;;  %v2394_v3 = vpop.eup %2393 }
 0x793   : > { %v1705_v30 = vmul.f32 %v2394_v3, %v3202_v23  ;;  %v1737_v32 = vmul.f32 %v2394_v3, %v3205_v9 }
 0x795   : > { %v1723_v40 = vsel %vm1595_vm3, %v1705_v30, 0.0  ;;  %v1755_v17 = vsel %vm1595_vm3, %v1737_v32, 0.0 }
 0x796   : > { %v2396_v7 = vpop.eup %2395  ;;  %1721 = vadd.xlane.f32.xlu1 %v1720_v18 }
 0x797   : > { %v1707_v48 = vmul.f32 %v2396_v7, %v3202_v23  ;;  %v1739_v47 = vmul.f32 %v2396_v7, %v3205_v9 }
 0x799   : > { %v1729_v26 = vsel %vm1595_vm3, %v1707_v48, 0.0  ;;  %v1761_v14 = vsel %vm1595_vm3, %v1739_v47, 0.0 }
 0x79a   : > { %1753 = vadd.xlane.f32.xlu1 %v1752_v42  ;;  %1730 = vadd.xlane.f32.xlu0 %v1729_v26 }
 0x79e   : > { %1759 = vadd.xlane.f32.xlu1 %v1758_v39  ;;  %1724 = vadd.xlane.f32.xlu0 %v1723_v40 }
 0x7a2   : > { %1756 = vadd.xlane.f32.xlu0 %v1755_v17 }
 0x7a6   : > { %1762 = vadd.xlane.f32.xlu0 %v1761_v14 }
 0x803   : > { %v1716_v13 = vpop.xlane.xlu1 %1715 }
 0x804   : > { %2397 = vlog2.f32 %v1716_v13 }
 0x807   : > { %v1748_v49 = vpop.xlane.xlu1 %1747 }
 0x808   : > { %2399 = vlog2.f32 %v1748_v49 }
 0x80b   : > { %v1710_v15 = vpop.xlane.xlu1 %1709 }
 0x80c   : > { %2401 = vlog2.f32 %v1710_v15 }
 0x80f   : > { %v1719_v31 = vpop.xlane.xlu0 %1718  ;;  %v1742_v52 = vpop.xlane.xlu1 %1741 }
 0x810   : > { %2403 = vlog2.f32 %v1719_v31 }
 0x811   : > { %2405 = vlog2.f32 %v1742_v52  ;;  %v2398_v50 = vpop.eup %2397 }
 0x812   : > { %v1769_v45 = vmul.f32 0.6931472, %v2398_v50 }
 0x813   : > { %v1751_v27 = vpop.xlane.xlu0 %1750 }
 0x814   : > { %2407 = vlog2.f32 %v1751_v27  ;;  %v1782_v33 = vmul.f32 %v3202_v23, %v1769_v45 }
 0x815   : > { %v2400_v53 = vpop.eup %2399 }
 0x816   : > { %v1793_v38 = vmul.f32 0.6931472, %v2400_v53 }
 0x817   : > { %v1713_v36 = vpop.xlane.xlu0 %1712 }
 0x818   : > { %v1806_v58 = vmul.f32 %v1793_v38, %v3205_v9  ;;  %2409 = vlog2.f32 %v1713_v36 }
 0x819   : > { %v2402_v54 = vpop.eup %2401 }
 0x81a   : > { %v1814_v21 = vadd.f32 %v1806_v58, %v1782_v33  ;;  %v1765_v56 = vmul.f32 0.6931472, %v2402_v54 }
 0x81b   : > { %v1728_v20 = vpop.xlane.xlu1 %1727  ;;  %v1745_v22 = vpop.xlane.xlu0 %1744 }
 0x81c   : > { %v1822_v8 = vsub.f32 %v3210_v6, %v1814_v21  ;;  %2411 = vlog2.f32 %v1745_v22  ;;  %v1780_v37 = vmul.f32 %v3202_v23, %v1765_v56 }
 0x81d   : > { %v2404_v0 = vpop.eup %2403 }
 0x81e   : > { %v2406_v55 = vpop.eup %2405  ;;  %1830 = vst.msk [vmem:[%s3293_s12 + $0x10] sm:$0xff] %vm1595_vm3, %v1822_v8  ;;  %v1771_v57 = vmul.f32 0.6931472, %v2404_v0 }
 0x81f   : > { %v1789_v5 = vmul.f32 0.6931472, %v2406_v55  ;;  %v1722_v24 = vpop.xlane.xlu1 %1721 }
 0x820   : > { %2413 = vlog2.f32 %v1722_v24  ;;  %v1783_v60 = vmul.f32 %v3202_v23, %v1771_v57 }
 0x821   : > { %v2408_v25 = vpop.eup %2407  ;;  %v1804_v59 = vmul.f32 %v1789_v5, %v3205_v9  ;;  %2415 = vlog2.f32 %v1728_v20 }
 0x822   : > { %v1795_v1 = vmul.f32 0.6931472, %v2408_v25 }
 0x823   : > { %v1812_v41 = vadd.f32 %v1804_v59, %v1780_v37  ;;  %v1754_v46 = vpop.xlane.xlu1 %1753  ;;  %v1731_v6 = vpop.xlane.xlu0 %1730 }
 0x824   : > { %v1807_v51 = vmul.f32 %v1795_v1, %v3205_v9  ;;  %2417 = vlog2.f32 %v1754_v46 }
 0x825   : > { %v1820_v61 = vsub.f32 %v3216_v62, %v1812_v41  ;;  %v2410_v43 = vpop.eup %2409 }
 0x826   : > { %v1815_v4 = vadd.f32 %v1807_v51, %v1783_v60  ;;  %v1767_v12 = vmul.f32 0.6931472, %v2410_v43 }
 0x827   : > { %1828 = vst.msk [vmem:[%s3293_s12] sm:$0xff] %vm1595_vm3, %v1820_v61  ;;  %v1760_v10 = vpop.xlane.xlu1 %1759  ;;  %v1725_v63 = vpop.xlane.xlu0 %1724 }
 0x828   : > { %v1823_v11 = vsub.f32 %v3223_v19, %v1815_v4  ;;  %2419 = vlog2.f32 %v1760_v10  ;;  %v1781_v7 = vmul.f32 %v3202_v23, %v1767_v12 }
 0x829   : > { %2421 = vlog2.f32 %v1725_v63  ;;  %v2412_v3 = vpop.eup %2411 }
 0x82a   : > { %1831 = vst.msk [vmem:[%s3293_s12 + $0x18] sm:$0xff] %vm1595_vm3, %v1823_v11  ;;  %v1791_v18 = vmul.f32 0.6931472, %v2412_v3  ;;  %2423 = vlog2.f32 %v1731_v6 }
 0x82b   : > { %v1757_v29 = vpop.xlane.xlu0 %1756 }
 0x82c   : > { %2425 = vlog2.f32 %v1757_v29  ;;  %v1805_v48 = vmul.f32 %v1791_v18, %v3205_v9 }
 0x82d   : > { %v2414_v62 = vpop.eup %2413 }
 0x82e   : > { %v1813_v42 = vadd.f32 %v1805_v48, %v1781_v7  ;;  %v2416_v44 = vpop.eup %2415  ;;  %v1773_v19 = vmul.f32 0.6931472, %v2414_v62 }
 0x82f   : > { %v1763_v26 = vpop.xlane.xlu0 %1762  ;;  %v1777_v32 = vmul.f32 0.6931472, %v2416_v44 }
 0x830   : > { %2427 = vlog2.f32 %v1763_v26  ;;  %v1821_v39 = vsub.f32 %v3229_v35, %v1813_v42  ;;  %v1784_v17 = vmul.f32 %v3202_v23, %v1773_v19 }
 0x831   : > { %v2418_v30 = vpop.eup %2417  ;;  %v1786_v52 = vmul.f32 %v3202_v23, %v1777_v32 }
 0x832   : > { %v1797_v40 = vmul.f32 0.6931472, %v2418_v30  ;;  %1829 = vst.msk [vmem:[%s3293_s12 + $0x8] sm:$0xff] %vm1595_vm3, %v1821_v39 }
 0x834   : > { %v1808_v47 = vmul.f32 %v1797_v40, %v3205_v9 }
 0x835   : > { %v2420_v14 = vpop.eup %2419 }
 0x836   : > { %v2422_v13 = vpop.eup %2421  ;;  %v1816_v49 = vadd.f32 %v1808_v47, %v1784_v17  ;;  %v1801_v15 = vmul.f32 0.6931472, %v2420_v14 }
 0x837   : > { %v2424_v31 = vpop.eup %2423  ;;  %v1775_v27 = vmul.f32 0.6931472, %v2422_v13 }
 0x838   : > { %v1824_v50 = vsub.f32 %v3236_v16, %v1816_v49  ;;  %v1810_v35 = vmul.f32 %v1801_v15, %v3205_v9  ;;  %v1779_v36 = vmul.f32 0.6931472, %v2424_v31 }
 0x839   : > { %v2426_v45 = vpop.eup %2425  ;;  %v1785_v58 = vmul.f32 %v3202_v23, %v1775_v27 }
 0x83a   : > { %1832 = vst.msk [vmem:[%s3293_s12 + $0x20] sm:$0xff] %vm1595_vm3, %v1824_v50  ;;  %v1818_v53 = vadd.f32 %v1810_v35, %v1786_v52  ;;  %v1799_v38 = vmul.f32 0.6931472, %v2426_v45  ;;  %v1787_v22 = vmul.f32 %v3202_v23, %v1779_v36 }
 0x83c   : > { %v1826_v33 = vsub.f32 %v3243_v34, %v1818_v53  ;;  %v1809_v54 = vmul.f32 %v1799_v38, %v3205_v9 }
 0x83d   : > { %v2428_v21 = vpop.eup %2427 }
 0x83e   : > { %1834 = vst.msk [vmem:[%s3293_s12 + $0x30] sm:$0xff] %vm1595_vm3, %v1826_v33  ;;  %v1817_v16 = vadd.f32 %v1809_v54, %v1785_v58  ;;  %v1803_v20 = vmul.f32 0.6931472, %v2428_v21 }
 0x840   : > { %v1825_v0 = vsub.f32 %v3252_v28, %v1817_v16  ;;  %v1811_v8 = vmul.f32 %v1803_v20, %v3205_v9 }
 0x842   : > { %1833 = vst.msk [vmem:[%s3293_s12 + $0x28] sm:$0xff] %vm1595_vm3, %v1825_v0  ;;  %v1819_v56 = vadd.f32 %v1811_v8, %v1787_v22 }
 0x844   : > { %v1827_v34 = vsub.f32 %v3260_v2, %v1819_v56 }
 0x846   : > { %1835 = vst.msk [vmem:[%s3293_s12 + $0x38] sm:$0xff] %vm1595_vm3, %v1827_v34 }
 0x847 PF: > { %p20_p13 = scmp.ge.s32.totalorder %s2633_s13, 4   ;;  %s3373_s30 = smov %s2544_s10 }
 0x848   : > { %s3374_s10 = smov %s2548_s11  ;;  %s3375_s11 = smov %s2642_s16 }
 0x849   : > { %s3376_s12 = smov %s2633_s13  ;;  %22 = sbr.rel (!%p20_p13) target bundleno = 6 (0x6), region = 130 }
 0x84e   :  { %1857 = vsyncpa [#allocation3], 1 }
 0x84f   :  { %1859 = vsyncpa [#allocation3 + $0x1], 1 }
 0x850   :  { %1860 = vsyncpa [#allocation5], 1 }
 0x851   :  { %1862 = vsyncpa [#allocation5 + $0x1], 1 }

</bundles_post_ra>
